<compile_context>
chip_gen: v6e
topology: v6e:2x2x1
jax: 0.10.0
libtpu: 0.0.40
codegen_flags: <defaults>
</compile_context>

<pallas_src>
import jax
import jax.numpy as jnp
from jax.experimental import pallas as pl
from jax.experimental.pallas import tpu as pltpu

NUM_CL = 10          # num_cl constructor arg (chosen small)
IN_FEATURES = 25410  # fixed by nn.Linear(25410, num_cl)


def _mlp_kernel(x_ref, w_ref, b_ref, o_ref):
    """Single-shot: sigmoid(relu(x) @ W^T + b).

    x_ref: (B, K)   w_ref: (N, K)  (native PyTorch Linear layout, K on lane axis)
    b_ref: (1, N)   o_ref: (B, N)
    """
    x_relu = jnp.maximum(x_ref[...], 0.0)                     # nn.ReLU()
    acc = jax.lax.dot_general(                                # x @ W^T (contract K with K)
        x_relu, w_ref[...],
        dimension_numbers=(((1,), (1,)), ((), ())),
        preferred_element_type=jnp.float32,
    )
    z = acc + b_ref[...]                                      # + bias
    o_ref[...] = jax.nn.sigmoid(z).astype(o_ref.dtype)        # nn.Sigmoid()


@jax.jit
def net_forward(x, w, b):
    """x: (B, C, H, W) float32; w: (num_cl, 25410); b: (num_cl,)."""
    B = x.shape[0]
    x_flat = x.reshape(B, -1)                  # torch.flatten(x, 1) (metadata-only reshape)
    K = x_flat.shape[1]
    assert K == IN_FEATURES
    n = w.shape[0]
    b2 = b.reshape(1, n)

    return pl.pallas_call(
        _mlp_kernel,
        out_shape=jax.ShapeDtypeStruct((B, n), x.dtype),
        # grid=() single invocation; full-extent blocks have no (8,128) divisibility
        # requirement, so no padding of x or W is needed.
        in_specs=[
            pl.BlockSpec((B, K), lambda: (0, 0)),   # x, whole array resident in VMEM
            pl.BlockSpec((n, K), lambda: (0, 0)),   # W in native (num_cl, K) lane-dense layout
            pl.BlockSpec((1, n), lambda: (0, 0)),   # bias
        ],
        out_specs=pl.BlockSpec((B, n), lambda: (0, 0)),
    )(x_flat, w, b2)


def init_params(key, num_cl=NUM_CL, in_features=IN_FEATURES):
    # Deterministic init mimicking nn.Linear default: U(-1/sqrt(fan_in), 1/sqrt(fan_in)).
    kw, kb = jax.random.split(key)
    bound = 1.0 / jnp.sqrt(jnp.float32(in_features))
    w = jax.random.uniform(kw, (num_cl, in_features), jnp.float32, -bound, bound)
    b = jax.random.uniform(kb, (num_cl,), jnp.float32, -bound, bound)
    return w, b


if __name__ == "__main__":
    key = jax.random.PRNGKey(0)
    kx, kp = jax.random.split(key)

    # Small batch; spatial dims chosen so C*H*W == 25410 (required by the Linear).
    B, C, H, W = 2, 10, 33, 77
    x = jax.random.normal(kx, (B, C, H, W), jnp.float32)
    w, b = init_params(kp)

    y = net_forward(x, w, b)
    jax.block_until_ready(y)

    # Cross-check against a plain-JAX reference of the same forward pass.
    ref = jax.nn.sigmoid(jnp.maximum(x.reshape(B, -1), 0.0) @ w.T + b)
    assert y.shape == (B, NUM_CL)
    assert jnp.allclose(y, ref, atol=1e-5, rtol=1e-5)

    print("KERNEL_OK")
</pallas_src>

<mosaic_0001>
module attributes {stable_mosaic.version = 11 : i64} {
  func.func @_mlp_kernel(%arg0: memref<2x25410xf32, #tpu.memory_space<vmem>>, %arg1: memref<10x25410xf32, #tpu.memory_space<vmem>>, %arg2: memref<1x10xf32, #tpu.memory_space<vmem>>, %arg3: memref<2x10xf32, #tpu.memory_space<vmem>>) attributes {dimension_semantics = [], scalar_prefetch = 0 : i64, scratch_operands = 0 : i64, tpu.core_type = #tpu.core_type<tc>} {
    %c0 = arith.constant 0 : index
    %c0_0 = arith.constant 0 : index
    %0 = vector.load %arg0[%c0, %c0_0] : memref<2x25410xf32, #tpu.memory_space<vmem>>, vector<2x25410xf32>
    %cst = arith.constant 0.000000e+00 : f32
    %1 = vector.broadcast %cst : f32 to vector<2x25410xf32>
    %2 = arith.maximumf %0, %1 : vector<2x25410xf32>
    %c0_1 = arith.constant 0 : index
    %c0_2 = arith.constant 0 : index
    %3 = vector.load %arg1[%c0_1, %c0_2] : memref<10x25410xf32, #tpu.memory_space<vmem>>, vector<10x25410xf32>
    %cst_3 = arith.constant dense<0.000000e+00> : vector<2x10xf32>
    %4 = tpu.matmul %2, %3, %cst_3 {dimension_numbers = #tpu.dot_dimension_numbers<[1], [1], [0], [0], [0, 0, 1, 0], [], []>} : vector<2x25410xf32>, vector<10x25410xf32>, vector<2x10xf32> -> vector<2x10xf32>
    %c0_4 = arith.constant 0 : index
    %c0_5 = arith.constant 0 : index
    %5 = vector.load %arg2[%c0_4, %c0_5] : memref<1x10xf32, #tpu.memory_space<vmem>>, vector<1x10xf32>
    %6 = vector.broadcast %5 : vector<1x10xf32> to vector<2x10xf32>
    %7 = arith.addf %4, %6 : vector<2x10xf32>
    %8 = arith.negf %7 : vector<2x10xf32>
    %9 = math.exp %8 : vector<2x10xf32>
    %cst_6 = arith.constant 1.000000e+00 : f32
    %10 = vector.broadcast %cst_6 : f32 to vector<2x10xf32>
    %11 = arith.addf %10, %9 : vector<2x10xf32>
    %12 = arith.divf %10, %11 : vector<2x10xf32>
    %c0_7 = arith.constant 0 : index
    %c0_8 = arith.constant 0 : index
    %13 = vector.load %arg3[%c0_7, %c0_8] : memref<2x10xf32, #tpu.memory_space<vmem>>, vector<2x10xf32>
    tpu.vector_store %arg3[%c0_7, %c0_8], %12 {strides = array<i32>} : memref<2x10xf32, #tpu.memory_space<vmem>>, vector<2x10xf32>,
    return
  }
}

</mosaic_0001>

<bundles_post_ra>
// kernel: net_forward.1
= control target key start
LH: loop header
LB: loop body
LE: loop exit
PB: predicated region body
PF: predicated region fallthrough
CT: control target
= control target key end

     0   :  { %8 = vsyncpa [#allocation3], 0  ;;  %s9061_s0 = inlined_call_operand.vmem [shape: f32[2,25410], index: 0, kind: input, shape index: {}]   ;;  %s9062_s1 = inlined_call_operand.hbm [shape: f32[10,25410], index: 1, kind: input, shape index: {}]   ;;  %s9063_s2 = inlined_call_operand.hbm [shape: f32[1,10], index: 2, kind: input, shape index: {}]   ;;  %s9064_s3 = inlined_call_operand.hbm [shape: f32[2,10], index: 3, kind: output, shape index: {}]  }
   0x1   :  { %9 = vsyncpa [#allocation6], 0 }
   0x2   :  { %10 = vsyncpa [#allocation4], 0  ;;  %s8769_s12 = smov [#allocation2]  }
   0x3   :  { %s18_s13 = sshll.u32 %s8769_s12, 4  ;;  %s19_s13 = int_to_ptr.vmem [resolvable:$true] %s18_s13 }
   0x4   :  { %s8711_s14 = scalar_lea.vmem %s19_s13, 50944  ;;  %p8716_p1 = scmp.lt.s32.totalorder %s19_s13, %s19_s13 }
   0x5   :  { %p8712_p0 = scmp.ne.s32.totalorder %s19_s13, %s8711_s14  ;;  %p8717_p2 = scmp.lt.s32.totalorder %s8711_s14, %s8711_s14 }
   0x7   :  { %p8718_p3 = por %p8717_p2, %p8716_p1 }
   0x9   :  { %p8719_p4 = pnand %p8718_p3, %p8712_p0 }
   0xb   :  { %8722 = shalt.err (!%p8719_p4)
}
   0xc   :  { %s8770_s15 = smov 25472   ;;  %s8771_s16 = smov 1592  }
   0xd   :  { %24 = dma.hbm_to_vmem [thread:$0]  %s9062_s1, 50944, %s19_s13, [#allocation3], %s8770_s15, %s8770_s15, %s8771_s16  }
   0xe   :  { %s8772_s19 = smov [#allocation5]  }
   0xf   :  { %s31_s20 = sshll.u32 %s8772_s19, 4  ;;  %s32_s20 = int_to_ptr.vmem [resolvable:$true] %s31_s20 }
  0x10   :  { %s8731_s21 = scalar_lea.vmem %s32_s20, 16  ;;  %s8735_s22 = scalar_lea.vmem %s32_s20, 32 }
  0x11   :  { %p8732_p5 = scmp.ne.s32.totalorder %s32_s20, %s8731_s21  ;;  %p8736_p6 = scmp.lt.s32.totalorder %s32_s20, %s32_s20 }
  0x12   :  { %p8737_p7 = scmp.lt.s32.totalorder %s8735_s22, %s8731_s21 }
  0x14   :  { %p8738_p8 = por %p8737_p7, %p8736_p6 }
  0x16   :  { %p8739_p9 = pnand %p8738_p8, %p8732_p5 }
  0x18   :  { %8742 = shalt.err (!%p8739_p9)
}
  0x19   :  { %34 = dma.hbm_to_vmem [thread:$0]  %s9063_s2, 16, %s32_s20, [#allocation6]  }
  0x1a   :  { %8763 = dma.done.wait [#allocation3], 50944  }
  0x1b   :  { %8764 = vsyncadd [#allocation3], 4294916352 }
  0x1c   :  { %8765 = dma.done.wait [#allocation6], 16  }
  0x1d   :  { %8766 = vsyncadd [#allocation6], 4294967280  ;;  %v600_v0 = vlaneseq  ;;  %v8773_v1 = vmov 1983009808   ;;  %v341_v5 = vld [vmem:[#allocation2 + $0x640] sm:$0x3] }
  0x1e   :  { %v598_v2 = vunpack.c.l.s4 %v8773_v1  ;;  %v343_v6 = vld [vmem:[#allocation2 + $0x650] sm:$0x3]  ;;  %v340_v7 = vld [vmem:[#allocation2 + $0x638] sm:$0x3]  ;;  %1680 = vmatprep.subr.mxu0 %v341_v5  ;;  %v342_v8 = vld [vmem:[#allocation2 + $0x648] sm:$0x3] }
  0x1f   :  { %v601_v4 = vshrl.u32 %v600_v0, 7  ;;  %1750 = vmatprep.subr.mxu1 %v343_v6  ;;  %v142_v9 = vld [vmem:[#allocation2 + $0x8] sm:$0xff]  ;;  %v144_v10 = vld [vmem:[#allocation2 + $0x18] sm:$0xff]  ;;  %1681 = vmatpush1.xpose.msra.mxu0 %v340_v7  ;;  %v41_v12 = vld [vmem:[%s9061_s0] sm:$0xff]  ;;  %vm1643_vm0 = vcmask 539648   ;;  %vm8775_vm1 = vmmov 0  }
  0x20   :  { %v599_v3 = vunpack.c.0.s8 %v598_v2  ;;  %1751 = vmatpush1.xpose.msra.mxu1 %v342_v8  ;;  %1682 = vmatprep.subr.mxu0 %v142_v9  ;;  %v141_v13 = vld [vmem:[#allocation2] sm:$0xff]  ;;  %v143_v14 = vld [vmem:[#allocation2 + $0x10] sm:$0xff]  ;;  %v91_v15 = vmax.f32 %v41_v12, 0.0  ;;  %v42_v20 = vld [vmem:[%s9061_s0 + $0x8] sm:$0xff]  ;;  %vm8658_vm2 = vcmask 74752  }
  0x21   :  { %1752 = vmatprep.subr.mxu1 %v144_v10  ;;  %v345_v16 = vld [vmem:[#allocation2 + $0x660] sm:$0x3]  ;;  %v347_v17 = vld [vmem:[#allocation2 + $0x670] sm:$0x3]  ;;  %v92_v21 = vmax.f32 %v42_v20, 0.0  ;;  %v146_v29 = vld [vmem:[#allocation2 + $0x28] sm:$0xff] }
  0x22   :  { %v8803_v11 = vsub.s32 %v599_v3, %v601_v4  ;;  %v596_v19 = vcombine.high %v91_v15, %v91_v15  ;;  %v344_v24 = vld [vmem:[#allocation2 + $0x658] sm:$0x3]  ;;  %v43_v27 = vld [vmem:[%s9061_s0 + $0x10] sm:$0xff]  ;;  %v346_v31 = vld [vmem:[#allocation2 + $0x668] sm:$0x3] }
  0x23   :  { %1683 = vmatpush1.xpose.msra.mxu0 %v141_v13  ;;  %v613_v26 = vcombine.high %v92_v21, %v92_v21  ;;  %v93_v30 = vmax.f32 %v43_v27, 0.0  ;;  %v148_v34 = vld [vmem:[#allocation2 + $0x38] sm:$0xff]  ;;  %v145_v38 = vld [vmem:[#allocation2 + $0x20] sm:$0xff]  ;;  %v147_v43 = vld [vmem:[#allocation2 + $0x30] sm:$0xff] }
  0x24   :  { %v603_v18 = vrot.slane %v91_v15, %v8803_v11  ;;  %1753 = vmatpush1.xpose.msra.mxu1 %v143_v14  ;;  %v610_v23 = vrot.slane %v596_v19, %v8803_v11  ;;  %1820 = vmatprep.subr.mxu0 %v345_v16  ;;  %v620_v25 = vrot.slane %v92_v21, %v8803_v11  ;;  %v44_v37 = vld [vmem:[%s9061_s0 + $0x18] sm:$0xff]  ;;  %v349_v40 = vld [vmem:[#allocation2 + $0x680] sm:$0x3]  ;;  %v351_v44 = vld [vmem:[#allocation2 + $0x690] sm:$0x3] }
  0x25   :  { %1890 = vmatprep.subr.mxu1 %v347_v17  ;;  %v627_v33 = vrot.slane %v613_v26, %v8803_v11  ;;  %v637_v35 = vrot.slane %v93_v30, %v8803_v11  ;;  %v630_v36 = vcombine.high %v93_v30, %v93_v30  ;;  %v94_v42 = vmax.f32 %v44_v37, 0.0  ;;  %v348_v46 = vld [vmem:[#allocation2 + $0x678] sm:$0x3]  ;;  %v150_v47 = vld [vmem:[#allocation2 + $0x48] sm:$0xff]  ;;  %v45_v51 = vld [vmem:[%s9061_s0 + $0x20] sm:$0xff] }
  0x26   :  { %v611_v22 = vcombine.high %v603_v18, %v603_v18  ;;  %v612_v28 = vcombine.high %v610_v23, %v610_v23  ;;  %v628_v32 = vcombine.high %v620_v25, %v620_v25  ;;  %v350_v50 = vld [vmem:[#allocation2 + $0x688] sm:$0x3]  ;;  %v152_v52 = vld [vmem:[#allocation2 + $0x58] sm:$0xff]  ;;  %v149_v54 = vld [vmem:[#allocation2 + $0x40] sm:$0xff]  ;;  %v95_v57 = vmax.f32 %v45_v51, 0.0 }
  0x27   :  { %v629_v39 = vcombine.high %v627_v33, %v627_v33  ;;  %v644_v41 = vrot.slane %v630_v36, %v8803_v11  ;;  %v645_v45 = vcombine.high %v637_v35, %v637_v35  ;;  %v647_v49 = vcombine.high %v94_v42, %v94_v42  ;;  %v353_v55 = vld [vmem:[#allocation2 + $0x6a0] sm:$0x3]  ;;  %v151_v58 = vld [vmem:[#allocation2 + $0x50] sm:$0xff]  ;;  %v352_v61 = vld [vmem:[#allocation2 + $0x698] sm:$0x3] }
  0x28   :  { %1716 = vmatprep.mubr.f32.mxu0 %v611_v22  ;;  %1786 = vmatprep.mubr.f32.mxu1 %v612_v28  ;;  %v654_v53 = vrot.slane %v94_v42, %v8803_v11  ;;  %v355_v59 = vld [vmem:[#allocation2 + $0x6b0] sm:$0x3]  ;;  %v154_v62 = vld [vmem:[#allocation2 + $0x68] sm:$0xff]  ;;  %v664_v0 = vcombine.high %v95_v57, %v95_v57  ;;  %v156_v3 = vld [vmem:[#allocation2 + $0x78] sm:$0xff]  ;;  %v671_v4 = vrot.slane %v95_v57, %v8803_v11 }
  0x29   :  { %1717 = vmatmul.mubr.f32.vlgmr.msra.gmra.mxu0 %v603_v18  ;;  %1787 = vmatmul.mubr.f32.vlgmr.msra.gmra.mxu1 %v610_v23  ;;  %v646_v48 = vcombine.high %v644_v41, %v644_v41  ;;  %v661_v56 = vrot.slane %v647_v49, %v8803_v11  ;;  %v354_v1 = vld [vmem:[#allocation2 + $0x6a8] sm:$0x3]  ;;  %v153_v5 = vld [vmem:[#allocation2 + $0x60] sm:$0xff]  ;;  %v155_v9 = vld [vmem:[#allocation2 + $0x70] sm:$0xff] }
  0x2a   :  { %1821 = vmatpush1.xpose.msra.mxu0 %v344_v24  ;;  %1891 = vmatpush1.xpose.msra.mxu1 %v346_v31  ;;  %v662_v60 = vcombine.high %v654_v53, %v654_v53  ;;  %v46_v2 = vld [vmem:[%s9061_s0 + $0x28] sm:$0xff]  ;;  %v357_v6 = vld [vmem:[#allocation2 + $0x6c0] sm:$0x3]  ;;  %v678_v7 = vrot.slane %v664_v0, %v8803_v11  ;;  %v359_v10 = vld [vmem:[#allocation2 + $0x6d0] sm:$0x3]  ;;  %v679_v12 = vcombine.high %v671_v4, %v671_v4 }
  0x2b   :  { %1822 = vmatprep.subr.mxu0 %v146_v29  ;;  %1856 = vmatprep.mubr.f32.mxu0 %v628_v32  ;;  %v663_v63 = vcombine.high %v661_v56, %v661_v56  ;;  %v96_v8 = vmax.f32 %v46_v2, 0.0  ;;  %v356_v13 = vld [vmem:[#allocation2 + $0x6b8] sm:$0x3]  ;;  %v158_v14 = vld [vmem:[#allocation2 + $0x88] sm:$0xff]  ;;  %v47_v18 = vld [vmem:[%s9061_s0 + $0x30] sm:$0xff] }
  0x2c   :  { %1892 = vmatprep.subr.mxu1 %v148_v34  ;;  %1926 = vmatprep.mubr.f32.mxu1 %v629_v39  ;;  %v680_v15 = vcombine.high %v678_v7, %v678_v7  ;;  %v358_v17 = vld [vmem:[#allocation2 + $0x6c8] sm:$0x3]  ;;  %v160_v19 = vld [vmem:[#allocation2 + $0x98] sm:$0xff]  ;;  %v157_v21 = vld [vmem:[#allocation2 + $0x80] sm:$0xff]  ;;  %v97_v24 = vmax.f32 %v47_v18, 0.0 }
  0x2d   :  { %v681_v16 = vcombine.high %v96_v8, %v96_v8  ;;  %v688_v20 = vrot.slane %v96_v8, %v8803_v11  ;;  %v361_v22 = vld [vmem:[#allocation2 + $0x6e0] sm:$0x3]  ;;  %v363_v26 = vld [vmem:[#allocation2 + $0x6f0] sm:$0x3]  ;;  %v360_v28 = vld [vmem:[#allocation2 + $0x6d8] sm:$0x3] }
  0x2e   :  { %1823 = vmatpush1.xpose.msra.mxu0 %v145_v38  ;;  %1893 = vmatpush1.xpose.msra.mxu1 %v147_v43  ;;  %v162_v29 = vld [vmem:[#allocation2 + $0xa8] sm:$0xff]  ;;  %v698_v31 = vcombine.high %v97_v24, %v97_v24  ;;  %v164_v34 = vld [vmem:[#allocation2 + $0xb8] sm:$0xff]  ;;  %v161_v36 = vld [vmem:[#allocation2 + $0xa0] sm:$0xff] }
  0x2f   :  { %1960 = vmatprep.subr.mxu0 %v349_v40  ;;  %2030 = vmatprep.subr.mxu1 %v351_v44  ;;  %v695_v23 = vrot.slane %v681_v16, %v8803_v11  ;;  %v696_v27 = vcombine.high %v688_v20, %v688_v20  ;;  %v362_v32 = vld [vmem:[#allocation2 + $0x6e8] sm:$0x3]  ;;  %v365_v37 = vld [vmem:[#allocation2 + $0x700] sm:$0x3]  ;;  %v163_v40 = vld [vmem:[#allocation2 + $0xb0] sm:$0xff] }
  0x30   :  { %v712_v38 = vrot.slane %v698_v31, %v8803_v11  ;;  %v364_v43 = vld [vmem:[#allocation2 + $0x6f8] sm:$0x3]  ;;  %v166_v44 = vld [vmem:[#allocation2 + $0xc8] sm:$0xff]  ;;  %v165_v51 = vld [vmem:[#allocation2 + $0xc0] sm:$0xff] }
  0x31   :  { %1857 = vmatmul.mubr.f32.vlgmr.msra.gmra.mxu0 %v620_v25  ;;  %1927 = vmatmul.mubr.f32.vlgmr.msra.gmra.mxu1 %v627_v33  ;;  %v159_v25 = vld [vmem:[#allocation2 + $0x90] sm:$0xff]  ;;  %v697_v30 = vcombine.high %v695_v23, %v695_v23  ;;  %v48_v33 = vld [vmem:[%s9061_s0 + $0x38] sm:$0xff]  ;;  %v169_v2 = vld [vmem:[#allocation2 + $0xe0] sm:$0xff] }
  0x32   :  { %1961 = vmatpush1.xpose.msra.mxu0 %v348_v46  ;;  %1996 = vmatprep.mubr.f32.mxu0 %v645_v45  ;;  %v98_v39 = vmax.f32 %v48_v33, 0.0  ;;  %v714_v45 = vcombine.high %v712_v38, %v712_v38  ;;  %v168_v49 = vld [vmem:[#allocation2 + $0xd8] sm:$0xff]  ;;  %v173_v18 = vld [vmem:[#allocation2 + $0x100] sm:$0xff] }
  0x33   :  { %1962 = vmatprep.subr.mxu0 %v150_v47  ;;  %2031 = vmatpush1.xpose.msra.mxu1 %v350_v50  ;;  %v366_v47 = vld [vmem:[#allocation2 + $0x708] sm:$0x3]  ;;  %v172_v0 = vld [vmem:[#allocation2 + $0xf8] sm:$0xff]  ;;  %v177_v33 = vld [vmem:[#allocation2 + $0x120] sm:$0xff] }
  0x34   :  { %2066 = vmatprep.mubr.f32.mxu1 %v646_v48  ;;  %2032 = vmatprep.subr.mxu1 %v152_v52  ;;  %v715_v46 = vcombine.high %v98_v39, %v98_v39  ;;  %v49_v48 = vld [vmem:[%s9061_s0 + $0x40] sm:$0xff]  ;;  %v722_v50 = vrot.slane %v98_v39, %v8803_v11  ;;  %v176_v16 = vld [vmem:[#allocation2 + $0x118] sm:$0xff] }
  0x35   :  { %v369_v52 = vld [vmem:[#allocation2 + $0x720] sm:$0x3]  ;;  %v180_v31 = vld [vmem:[#allocation2 + $0x138] sm:$0xff] }
  0x36   :  { %1963 = vmatpush1.xpose.msra.mxu0 %v149_v54  ;;  %v99_v54 = vmax.f32 %v49_v48, 0.0  ;;  %v730_v57 = vcombine.high %v722_v50, %v722_v50  ;;  %v181_v48 = vld [vmem:[#allocation2 + $0x140] sm:$0xff] }
  0x37   :  { %2100 = vmatprep.subr.mxu0 %v353_v55  ;;  %2033 = vmatpush1.xpose.msra.mxu1 %v151_v58  ;;  %v167_v55 = vld [vmem:[#allocation2 + $0xd0] sm:$0xff]  ;;  %v368_v58 = vld [vmem:[#allocation2 + $0x718] sm:$0x3] }
  0x38   :  { %2170 = vmatprep.subr.mxu1 %v355_v59  ;;  %v170_v59 = vld [vmem:[#allocation2 + $0xe8] sm:$0xff] }
  0x39   :  { %1997 = vmatmul.mubr.f32.vlgmr.msra.gmra.mxu0 %v637_v35  ;;  %v705_v35 = vrot.slane %v97_v24, %v8803_v11 }
  0x3a   :  { %2101 = vmatpush1.xpose.msra.mxu0 %v352_v61  ;;  %2136 = vmatprep.mubr.f32.mxu0 %v662_v60  ;;  %v732_v61 = vcombine.high %v99_v54, %v99_v54 }
  0x3b   :  { %2067 = vmatmul.mubr.f32.vlgmr.msra.gmra.mxu1 %v644_v41  ;;  %2102 = vmatprep.subr.mxu0 %v154_v62  ;;  %v367_v41 = vld [vmem:[#allocation2 + $0x710] sm:$0x3]  ;;  %v713_v42 = vcombine.high %v705_v35, %v705_v35  ;;  %v370_v62 = vld [vmem:[#allocation2 + $0x728] sm:$0x3] }
  0x3c   :  { %2171 = vmatpush1.xpose.msra.mxu1 %v354_v1  ;;  %2206 = vmatprep.mubr.f32.mxu1 %v663_v63  ;;  %v50_v63 = vld [vmem:[%s9061_s0 + $0x48] sm:$0xff]  ;;  %v739_v1 = vrot.slane %v99_v54, %v8803_v11 }
  0x3d   :  { %2172 = vmatprep.subr.mxu1 %v156_v3  ;;  %v373_v3 = vld [vmem:[#allocation2 + $0x740] sm:$0x3] }
  0x3e   :  { %2103 = vmatpush1.xpose.msra.mxu0 %v153_v5  ;;  %v100_v5 = vmax.f32 %v50_v63, 0.0  ;;  %v747_v8 = vcombine.high %v739_v1, %v739_v1  ;;  %v185_v63 = vld [vmem:[#allocation2 + $0x160] sm:$0xff] }
  0x3f   :  { %2240 = vmatprep.subr.mxu0 %v357_v6  ;;  %v171_v6 = vld [vmem:[#allocation2 + $0xf0] sm:$0xff] }
  0x40   :  { %2173 = vmatpush1.xpose.msra.mxu1 %v155_v9  ;;  %v372_v9 = vld [vmem:[#allocation2 + $0x738] sm:$0x3] }
  0x41   :  { %2137 = vmatmul.mubr.f32.vlgmr.msra.gmra.mxu0 %v654_v53  ;;  %2310 = vmatprep.subr.mxu1 %v359_v10  ;;  %v729_v53 = vrot.slane %v715_v46, %v8803_v11  ;;  %v174_v10 = vld [vmem:[#allocation2 + $0x108] sm:$0xff]  ;;  %v184_v46 = vld [vmem:[#allocation2 + $0x158] sm:$0xff] }
  0x42   :  { %2241 = vmatpush1.xpose.msra.mxu0 %v356_v13  ;;  %2276 = vmatprep.mubr.f32.mxu0 %v679_v12  ;;  %v749_v13 = vcombine.high %v100_v5, %v100_v5 }
  0x43   :  { %2207 = vmatmul.mubr.f32.vlgmr.msra.gmra.mxu1 %v661_v56  ;;  %2242 = vmatprep.subr.mxu0 %v158_v14  ;;  %v371_v56 = vld [vmem:[#allocation2 + $0x730] sm:$0x3]  ;;  %v731_v60 = vcombine.high %v729_v53, %v729_v53  ;;  %v374_v14 = vld [vmem:[#allocation2 + $0x748] sm:$0x3] }
  0x44   :  { %2311 = vmatpush1.xpose.msra.mxu1 %v358_v17  ;;  %2346 = vmatprep.mubr.f32.mxu1 %v680_v15  ;;  %v51_v15 = vld [vmem:[%s9061_s0 + $0x50] sm:$0xff]  ;;  %v756_v17 = vrot.slane %v100_v5, %v8803_v11 }
  0x45   :  { %2312 = vmatprep.subr.mxu1 %v160_v19  ;;  %v377_v19 = vld [vmem:[#allocation2 + $0x760] sm:$0x3] }
  0x46   :  { %2243 = vmatpush1.xpose.msra.mxu0 %v157_v21  ;;  %v101_v21 = vmax.f32 %v51_v15, 0.0  ;;  %v764_v24 = vcombine.high %v756_v17, %v756_v17  ;;  %v189_v15 = vld [vmem:[#allocation2 + $0x180] sm:$0xff] }
  0x47   :  { %2380 = vmatprep.subr.mxu0 %v361_v22  ;;  %v175_v22 = vld [vmem:[#allocation2 + $0x110] sm:$0xff] }
  0x48   :  { %2313 = vmatpush1.xpose.msra.mxu1 %v159_v25  ;;  %v376_v25 = vld [vmem:[#allocation2 + $0x758] sm:$0x3] }
  0x49   :  { %2277 = vmatmul.mubr.f32.vlgmr.msra.gmra.mxu0 %v671_v4  ;;  %2450 = vmatprep.subr.mxu1 %v363_v26  ;;  %v746_v4 = vrot.slane %v732_v61, %v8803_v11  ;;  %v178_v26 = vld [vmem:[#allocation2 + $0x128] sm:$0xff]  ;;  %v188_v61 = vld [vmem:[#allocation2 + $0x178] sm:$0xff] }
  0x4a   :  { %2381 = vmatpush1.xpose.msra.mxu0 %v360_v28  ;;  %2416 = vmatprep.mubr.f32.mxu0 %v696_v27  ;;  %v766_v28 = vcombine.high %v101_v21, %v101_v21 }
  0x4b   :  { %2347 = vmatmul.mubr.f32.vlgmr.msra.gmra.mxu1 %v678_v7  ;;  %2382 = vmatprep.subr.mxu0 %v162_v29  ;;  %v375_v7 = vld [vmem:[#allocation2 + $0x750] sm:$0x3]  ;;  %v748_v12 = vcombine.high %v746_v4, %v746_v4  ;;  %v378_v29 = vld [vmem:[#allocation2 + $0x768] sm:$0x3] }
  0x4c   :  { %2451 = vmatpush1.xpose.msra.mxu1 %v362_v32  ;;  %2486 = vmatprep.mubr.f32.mxu1 %v697_v30  ;;  %v52_v30 = vld [vmem:[%s9061_s0 + $0x58] sm:$0xff]  ;;  %v773_v32 = vrot.slane %v101_v21, %v8803_v11 }
  0x4d   :  { %2452 = vmatprep.subr.mxu1 %v164_v34  ;;  %v381_v34 = vld [vmem:[#allocation2 + $0x780] sm:$0x3] }
  0x4e   :  { %2383 = vmatpush1.xpose.msra.mxu0 %v161_v36  ;;  %v102_v36 = vmax.f32 %v52_v30, 0.0  ;;  %v781_v39 = vcombine.high %v773_v32, %v773_v32  ;;  %v193_v30 = vld [vmem:[#allocation2 + $0x1a0] sm:$0xff] }
  0x4f   :  { %2520 = vmatprep.subr.mxu0 %v365_v37  ;;  %v179_v37 = vld [vmem:[#allocation2 + $0x130] sm:$0xff] }
  0x50   :  { %2453 = vmatpush1.xpose.msra.mxu1 %v163_v40  ;;  %v380_v40 = vld [vmem:[#allocation2 + $0x778] sm:$0x3] }
  0x51   :  { %2417 = vmatmul.mubr.f32.vlgmr.msra.gmra.mxu0 %v688_v20  ;;  %2590 = vmatprep.subr.mxu1 %v367_v41  ;;  %v763_v20 = vrot.slane %v749_v13, %v8803_v11  ;;  %v182_v41 = vld [vmem:[#allocation2 + $0x148] sm:$0xff]  ;;  %v192_v13 = vld [vmem:[#allocation2 + $0x198] sm:$0xff] }
  0x52   :  { %2521 = vmatpush1.xpose.msra.mxu0 %v364_v43  ;;  %2556 = vmatprep.mubr.f32.mxu0 %v713_v42  ;;  %v783_v43 = vcombine.high %v102_v36, %v102_v36 }
  0x53   :  { %2487 = vmatmul.mubr.f32.vlgmr.msra.gmra.mxu1 %v695_v23  ;;  %2522 = vmatprep.subr.mxu0 %v166_v44  ;;  %v379_v23 = vld [vmem:[#allocation2 + $0x770] sm:$0x3]  ;;  %v765_v27 = vcombine.high %v763_v20, %v763_v20  ;;  %v382_v44 = vld [vmem:[#allocation2 + $0x788] sm:$0x3] }
  0x54   :  { %2591 = vmatpush1.xpose.msra.mxu1 %v366_v47  ;;  %2626 = vmatprep.mubr.f32.mxu1 %v714_v45  ;;  %v53_v45 = vld [vmem:[%s9061_s0 + $0x60] sm:$0xff]  ;;  %v790_v47 = vrot.slane %v102_v36, %v8803_v11 }
  0x55   :  { %2592 = vmatprep.subr.mxu1 %v168_v49  ;;  %v385_v49 = vld [vmem:[#allocation2 + $0x7a0] sm:$0x3] }
  0x56   :  { %2523 = vmatpush1.xpose.msra.mxu0 %v165_v51  ;;  %v103_v51 = vmax.f32 %v53_v45, 0.0  ;;  %v798_v54 = vcombine.high %v790_v47, %v790_v47  ;;  %v197_v45 = vld [vmem:[#allocation2 + $0x1c0] sm:$0xff] }
  0x57   :  { %2660 = vmatprep.subr.mxu0 %v369_v52  ;;  %v183_v52 = vld [vmem:[#allocation2 + $0x150] sm:$0xff] }
  0x58   :  { %2593 = vmatpush1.xpose.msra.mxu1 %v167_v55  ;;  %v384_v55 = vld [vmem:[#allocation2 + $0x798] sm:$0x3] }
  0x59   :  { %2557 = vmatmul.mubr.f32.vlgmr.msra.gmra.mxu0 %v705_v35  ;;  %2730 = vmatprep.subr.mxu1 %v371_v56  ;;  %v780_v35 = vrot.slane %v766_v28, %v8803_v11  ;;  %v186_v56 = vld [vmem:[#allocation2 + $0x168] sm:$0xff]  ;;  %v196_v28 = vld [vmem:[#allocation2 + $0x1b8] sm:$0xff] }
  0x5a   :  { %2661 = vmatpush1.xpose.msra.mxu0 %v368_v58  ;;  %2696 = vmatprep.mubr.f32.mxu0 %v730_v57  ;;  %v800_v58 = vcombine.high %v103_v51, %v103_v51 }
  0x5b   :  { %2627 = vmatmul.mubr.f32.vlgmr.msra.gmra.mxu1 %v712_v38  ;;  %2662 = vmatprep.subr.mxu0 %v170_v59  ;;  %v383_v38 = vld [vmem:[#allocation2 + $0x790] sm:$0x3]  ;;  %v782_v42 = vcombine.high %v780_v35, %v780_v35  ;;  %v386_v59 = vld [vmem:[#allocation2 + $0x7a8] sm:$0x3] }
  0x5c   :  { %2731 = vmatpush1.xpose.msra.mxu1 %v370_v62  ;;  %2766 = vmatprep.mubr.f32.mxu1 %v731_v60  ;;  %v54_v60 = vld [vmem:[%s9061_s0 + $0x68] sm:$0xff]  ;;  %v807_v62 = vrot.slane %v103_v51, %v8803_v11 }
  0x5d   :  { %2732 = vmatprep.subr.mxu1 %v172_v0  ;;  %v389_v0 = vld [vmem:[#allocation2 + $0x7c0] sm:$0x3] }
  0x5e   :  { %2663 = vmatpush1.xpose.msra.mxu0 %v169_v2  ;;  %v104_v2 = vmax.f32 %v54_v60, 0.0  ;;  %v815_v5 = vcombine.high %v807_v62, %v807_v62  ;;  %v201_v60 = vld [vmem:[#allocation2 + $0x1e0] sm:$0xff] }
  0x5f   :  { %2800 = vmatprep.subr.mxu0 %v373_v3  ;;  %v187_v3 = vld [vmem:[#allocation2 + $0x170] sm:$0xff] }
  0x60   :  { %2733 = vmatpush1.xpose.msra.mxu1 %v171_v6  ;;  %v388_v6 = vld [vmem:[#allocation2 + $0x7b8] sm:$0x3] }
  0x61   :  { %2697 = vmatmul.mubr.f32.vlgmr.msra.gmra.mxu0 %v722_v50  ;;  %2870 = vmatprep.subr.mxu1 %v375_v7  ;;  %v797_v50 = vrot.slane %v783_v43, %v8803_v11  ;;  %v190_v7 = vld [vmem:[#allocation2 + $0x188] sm:$0xff]  ;;  %v200_v43 = vld [vmem:[#allocation2 + $0x1d8] sm:$0xff] }
  0x62   :  { %2801 = vmatpush1.xpose.msra.mxu0 %v372_v9  ;;  %2836 = vmatprep.mubr.f32.mxu0 %v747_v8  ;;  %v817_v9 = vcombine.high %v104_v2, %v104_v2 }
  0x63   :  { %2767 = vmatmul.mubr.f32.vlgmr.msra.gmra.mxu1 %v729_v53  ;;  %2802 = vmatprep.subr.mxu0 %v174_v10  ;;  %v387_v53 = vld [vmem:[#allocation2 + $0x7b0] sm:$0x3]  ;;  %v799_v57 = vcombine.high %v797_v50, %v797_v50  ;;  %v390_v10 = vld [vmem:[#allocation2 + $0x7c8] sm:$0x3] }
  0x64   :  { %2871 = vmatpush1.xpose.msra.mxu1 %v374_v14  ;;  %2906 = vmatprep.mubr.f32.mxu1 %v748_v12  ;;  %v55_v12 = vld [vmem:[%s9061_s0 + $0x70] sm:$0xff]  ;;  %v824_v14 = vrot.slane %v104_v2, %v8803_v11 }
  0x65   :  { %2872 = vmatprep.subr.mxu1 %v176_v16  ;;  %v393_v16 = vld [vmem:[#allocation2 + $0x7e0] sm:$0x3] }
  0x66   :  { %2803 = vmatpush1.xpose.msra.mxu0 %v173_v18  ;;  %v105_v18 = vmax.f32 %v55_v12, 0.0  ;;  %v832_v21 = vcombine.high %v824_v14, %v824_v14  ;;  %v205_v12 = vld [vmem:[#allocation2 + $0x200] sm:$0xff] }
  0x67   :  { %2940 = vmatprep.subr.mxu0 %v377_v19  ;;  %v191_v19 = vld [vmem:[#allocation2 + $0x190] sm:$0xff] }
  0x68   :  { %2873 = vmatpush1.xpose.msra.mxu1 %v175_v22  ;;  %v392_v22 = vld [vmem:[#allocation2 + $0x7d8] sm:$0x3] }
  0x69   :  { %2837 = vmatmul.mubr.f32.vlgmr.msra.gmra.mxu0 %v739_v1  ;;  %3010 = vmatprep.subr.mxu1 %v379_v23  ;;  %v814_v1 = vrot.slane %v800_v58, %v8803_v11  ;;  %v194_v23 = vld [vmem:[#allocation2 + $0x1a8] sm:$0xff]  ;;  %v204_v58 = vld [vmem:[#allocation2 + $0x1f8] sm:$0xff] }
  0x6a   :  { %2941 = vmatpush1.xpose.msra.mxu0 %v376_v25  ;;  %2976 = vmatprep.mubr.f32.mxu0 %v764_v24  ;;  %v834_v25 = vcombine.high %v105_v18, %v105_v18 }
  0x6b   :  { %2907 = vmatmul.mubr.f32.vlgmr.msra.gmra.mxu1 %v746_v4  ;;  %2942 = vmatprep.subr.mxu0 %v178_v26  ;;  %v391_v4 = vld [vmem:[#allocation2 + $0x7d0] sm:$0x3]  ;;  %v816_v8 = vcombine.high %v814_v1, %v814_v1  ;;  %v394_v26 = vld [vmem:[#allocation2 + $0x7e8] sm:$0x3] }
  0x6c   :  { %3011 = vmatpush1.xpose.msra.mxu1 %v378_v29  ;;  %3046 = vmatprep.mubr.f32.mxu1 %v765_v27  ;;  %v56_v27 = vld [vmem:[%s9061_s0 + $0x78] sm:$0xff]  ;;  %v841_v29 = vrot.slane %v105_v18, %v8803_v11 }
  0x6d   :  { %3012 = vmatprep.subr.mxu1 %v180_v31  ;;  %v397_v31 = vld [vmem:[#allocation2 + $0x800] sm:$0x3] }
  0x6e   :  { %2943 = vmatpush1.xpose.msra.mxu0 %v177_v33  ;;  %v106_v33 = vmax.f32 %v56_v27, 0.0  ;;  %v849_v36 = vcombine.high %v841_v29, %v841_v29  ;;  %v209_v27 = vld [vmem:[#allocation2 + $0x220] sm:$0xff] }
  0x6f   :  { %3080 = vmatprep.subr.mxu0 %v381_v34  ;;  %v195_v34 = vld [vmem:[#allocation2 + $0x1b0] sm:$0xff] }
  0x70   :  { %3013 = vmatpush1.xpose.msra.mxu1 %v179_v37  ;;  %v396_v37 = vld [vmem:[#allocation2 + $0x7f8] sm:$0x3] }
  0x71   :  { %2977 = vmatmul.mubr.f32.vlgmr.msra.gmra.mxu0 %v756_v17  ;;  %3150 = vmatprep.subr.mxu1 %v383_v38  ;;  %v831_v17 = vrot.slane %v817_v9, %v8803_v11  ;;  %v198_v38 = vld [vmem:[#allocation2 + $0x1c8] sm:$0xff]  ;;  %v208_v9 = vld [vmem:[#allocation2 + $0x218] sm:$0xff] }
  0x72   :  { %3081 = vmatpush1.xpose.msra.mxu0 %v380_v40  ;;  %3116 = vmatprep.mubr.f32.mxu0 %v781_v39  ;;  %v851_v40 = vcombine.high %v106_v33, %v106_v33 }
  0x73   :  { %3047 = vmatmul.mubr.f32.vlgmr.msra.gmra.mxu1 %v763_v20  ;;  %3082 = vmatprep.subr.mxu0 %v182_v41  ;;  %v395_v20 = vld [vmem:[#allocation2 + $0x7f0] sm:$0x3]  ;;  %v833_v24 = vcombine.high %v831_v17, %v831_v17  ;;  %v398_v41 = vld [vmem:[#allocation2 + $0x808] sm:$0x3] }
  0x74   :  { %3151 = vmatpush1.xpose.msra.mxu1 %v382_v44  ;;  %3186 = vmatprep.mubr.f32.mxu1 %v782_v42  ;;  %v57_v42 = vld [vmem:[%s9061_s0 + $0x80] sm:$0xff]  ;;  %v858_v44 = vrot.slane %v106_v33, %v8803_v11 }
  0x75   :  { %3152 = vmatprep.subr.mxu1 %v184_v46  ;;  %v401_v46 = vld [vmem:[#allocation2 + $0x820] sm:$0x3] }
  0x76   :  { %3083 = vmatpush1.xpose.msra.mxu0 %v181_v48  ;;  %v107_v48 = vmax.f32 %v57_v42, 0.0  ;;  %v866_v51 = vcombine.high %v858_v44, %v858_v44  ;;  %v213_v42 = vld [vmem:[#allocation2 + $0x240] sm:$0xff] }
  0x77   :  { %3220 = vmatprep.subr.mxu0 %v385_v49  ;;  %v199_v49 = vld [vmem:[#allocation2 + $0x1d0] sm:$0xff] }
  0x78   :  { %3153 = vmatpush1.xpose.msra.mxu1 %v183_v52  ;;  %v400_v52 = vld [vmem:[#allocation2 + $0x818] sm:$0x3] }
  0x79   :  { %3117 = vmatmul.mubr.f32.vlgmr.msra.gmra.mxu0 %v773_v32  ;;  %3290 = vmatprep.subr.mxu1 %v387_v53  ;;  %v848_v32 = vrot.slane %v834_v25, %v8803_v11  ;;  %v202_v53 = vld [vmem:[#allocation2 + $0x1e8] sm:$0xff]  ;;  %v212_v25 = vld [vmem:[#allocation2 + $0x238] sm:$0xff] }
  0x7a   :  { %3221 = vmatpush1.xpose.msra.mxu0 %v384_v55  ;;  %3256 = vmatprep.mubr.f32.mxu0 %v798_v54  ;;  %v868_v55 = vcombine.high %v107_v48, %v107_v48 }
  0x7b   :  { %3187 = vmatmul.mubr.f32.vlgmr.msra.gmra.mxu1 %v780_v35  ;;  %3222 = vmatprep.subr.mxu0 %v186_v56  ;;  %v399_v35 = vld [vmem:[#allocation2 + $0x810] sm:$0x3]  ;;  %v850_v39 = vcombine.high %v848_v32, %v848_v32  ;;  %v402_v56 = vld [vmem:[#allocation2 + $0x828] sm:$0x3] }
  0x7c   :  { %3291 = vmatpush1.xpose.msra.mxu1 %v386_v59  ;;  %3326 = vmatprep.mubr.f32.mxu1 %v799_v57  ;;  %v58_v57 = vld [vmem:[%s9061_s0 + $0x88] sm:$0xff]  ;;  %v875_v59 = vrot.slane %v107_v48, %v8803_v11 }
  0x7d   :  { %3292 = vmatprep.subr.mxu1 %v188_v61  ;;  %v405_v61 = vld [vmem:[#allocation2 + $0x840] sm:$0x3] }
  0x7e   :  { %3223 = vmatpush1.xpose.msra.mxu0 %v185_v63  ;;  %v108_v63 = vmax.f32 %v58_v57, 0.0  ;;  %v883_v2 = vcombine.high %v875_v59, %v875_v59  ;;  %v217_v57 = vld [vmem:[#allocation2 + $0x260] sm:$0xff] }
  0x7f   :  { %3360 = vmatprep.subr.mxu0 %v389_v0  ;;  %v203_v0 = vld [vmem:[#allocation2 + $0x1f0] sm:$0xff] }
  0x80   :  { %3293 = vmatpush1.xpose.msra.mxu1 %v187_v3  ;;  %v404_v3 = vld [vmem:[#allocation2 + $0x838] sm:$0x3] }
  0x81   :  { %3257 = vmatmul.mubr.f32.vlgmr.msra.gmra.mxu0 %v790_v47  ;;  %3430 = vmatprep.subr.mxu1 %v391_v4  ;;  %v865_v47 = vrot.slane %v851_v40, %v8803_v11  ;;  %v206_v4 = vld [vmem:[#allocation2 + $0x208] sm:$0xff]  ;;  %v216_v40 = vld [vmem:[#allocation2 + $0x258] sm:$0xff] }
  0x82   :  { %3361 = vmatpush1.xpose.msra.mxu0 %v388_v6  ;;  %3396 = vmatprep.mubr.f32.mxu0 %v815_v5  ;;  %v885_v6 = vcombine.high %v108_v63, %v108_v63 }
  0x83   :  { %3327 = vmatmul.mubr.f32.vlgmr.msra.gmra.mxu1 %v797_v50  ;;  %3362 = vmatprep.subr.mxu0 %v190_v7  ;;  %v403_v50 = vld [vmem:[#allocation2 + $0x830] sm:$0x3]  ;;  %v867_v54 = vcombine.high %v865_v47, %v865_v47  ;;  %v406_v7 = vld [vmem:[#allocation2 + $0x848] sm:$0x3] }
  0x84   :  { %3431 = vmatpush1.xpose.msra.mxu1 %v390_v10  ;;  %3466 = vmatprep.mubr.f32.mxu1 %v816_v8  ;;  %v59_v8 = vld [vmem:[%s9061_s0 + $0x90] sm:$0xff]  ;;  %v892_v10 = vrot.slane %v108_v63, %v8803_v11 }
  0x85   :  { %3432 = vmatprep.subr.mxu1 %v192_v13  ;;  %v409_v13 = vld [vmem:[#allocation2 + $0x860] sm:$0x3] }
  0x86   :  { %3363 = vmatpush1.xpose.msra.mxu0 %v189_v15  ;;  %v109_v15 = vmax.f32 %v59_v8, 0.0  ;;  %v900_v18 = vcombine.high %v892_v10, %v892_v10  ;;  %v221_v8 = vld [vmem:[#allocation2 + $0x280] sm:$0xff] }
  0x87   :  { %3500 = vmatprep.subr.mxu0 %v393_v16  ;;  %v207_v16 = vld [vmem:[#allocation2 + $0x210] sm:$0xff] }
  0x88   :  { %3433 = vmatpush1.xpose.msra.mxu1 %v191_v19  ;;  %v408_v19 = vld [vmem:[#allocation2 + $0x858] sm:$0x3] }
  0x89   :  { %3397 = vmatmul.mubr.f32.vlgmr.msra.gmra.mxu0 %v807_v62  ;;  %3570 = vmatprep.subr.mxu1 %v395_v20  ;;  %v882_v62 = vrot.slane %v868_v55, %v8803_v11  ;;  %v210_v20 = vld [vmem:[#allocation2 + $0x228] sm:$0xff]  ;;  %v220_v55 = vld [vmem:[#allocation2 + $0x278] sm:$0xff] }
  0x8a   :  { %3501 = vmatpush1.xpose.msra.mxu0 %v392_v22  ;;  %3536 = vmatprep.mubr.f32.mxu0 %v832_v21  ;;  %v902_v22 = vcombine.high %v109_v15, %v109_v15 }
  0x8b   :  { %3467 = vmatmul.mubr.f32.vlgmr.msra.gmra.mxu1 %v814_v1  ;;  %3502 = vmatprep.subr.mxu0 %v194_v23  ;;  %v407_v1 = vld [vmem:[#allocation2 + $0x850] sm:$0x3]  ;;  %v884_v5 = vcombine.high %v882_v62, %v882_v62  ;;  %v410_v23 = vld [vmem:[#allocation2 + $0x868] sm:$0x3] }
  0x8c   :  { %3571 = vmatpush1.xpose.msra.mxu1 %v394_v26  ;;  %3606 = vmatprep.mubr.f32.mxu1 %v833_v24  ;;  %v60_v24 = vld [vmem:[%s9061_s0 + $0x98] sm:$0xff]  ;;  %v909_v26 = vrot.slane %v109_v15, %v8803_v11 }
  0x8d   :  { %3572 = vmatprep.subr.mxu1 %v196_v28  ;;  %v413_v28 = vld [vmem:[#allocation2 + $0x880] sm:$0x3] }
  0x8e   :  { %3503 = vmatpush1.xpose.msra.mxu0 %v193_v30  ;;  %v110_v30 = vmax.f32 %v60_v24, 0.0  ;;  %v917_v33 = vcombine.high %v909_v26, %v909_v26  ;;  %v225_v24 = vld [vmem:[#allocation2 + $0x2a0] sm:$0xff] }
  0x8f   :  { %3640 = vmatprep.subr.mxu0 %v397_v31  ;;  %v211_v31 = vld [vmem:[#allocation2 + $0x230] sm:$0xff] }
  0x90   :  { %3573 = vmatpush1.xpose.msra.mxu1 %v195_v34  ;;  %v412_v34 = vld [vmem:[#allocation2 + $0x878] sm:$0x3] }
  0x91   :  { %3537 = vmatmul.mubr.f32.vlgmr.msra.gmra.mxu0 %v824_v14  ;;  %3710 = vmatprep.subr.mxu1 %v399_v35  ;;  %v899_v14 = vrot.slane %v885_v6, %v8803_v11  ;;  %v214_v35 = vld [vmem:[#allocation2 + $0x248] sm:$0xff]  ;;  %v224_v6 = vld [vmem:[#allocation2 + $0x298] sm:$0xff] }
  0x92   :  { %3641 = vmatpush1.xpose.msra.mxu0 %v396_v37  ;;  %3676 = vmatprep.mubr.f32.mxu0 %v849_v36  ;;  %v919_v37 = vcombine.high %v110_v30, %v110_v30 }
  0x93   :  { %3607 = vmatmul.mubr.f32.vlgmr.msra.gmra.mxu1 %v831_v17  ;;  %3642 = vmatprep.subr.mxu0 %v198_v38  ;;  %v411_v17 = vld [vmem:[#allocation2 + $0x870] sm:$0x3]  ;;  %v901_v21 = vcombine.high %v899_v14, %v899_v14  ;;  %v414_v38 = vld [vmem:[#allocation2 + $0x888] sm:$0x3] }
  0x94   :  { %3711 = vmatpush1.xpose.msra.mxu1 %v398_v41  ;;  %3746 = vmatprep.mubr.f32.mxu1 %v850_v39  ;;  %v61_v39 = vld [vmem:[%s9061_s0 + $0xa0] sm:$0xff]  ;;  %v926_v41 = vrot.slane %v110_v30, %v8803_v11 }
  0x95   :  { %3712 = vmatprep.subr.mxu1 %v200_v43  ;;  %v417_v43 = vld [vmem:[#allocation2 + $0x8a0] sm:$0x3] }
  0x96   :  { %3643 = vmatpush1.xpose.msra.mxu0 %v197_v45  ;;  %v111_v45 = vmax.f32 %v61_v39, 0.0  ;;  %v934_v48 = vcombine.high %v926_v41, %v926_v41  ;;  %v229_v39 = vld [vmem:[#allocation2 + $0x2c0] sm:$0xff] }
  0x97   :  { %3780 = vmatprep.subr.mxu0 %v401_v46  ;;  %v215_v46 = vld [vmem:[#allocation2 + $0x250] sm:$0xff] }
  0x98   :  { %3713 = vmatpush1.xpose.msra.mxu1 %v199_v49  ;;  %v416_v49 = vld [vmem:[#allocation2 + $0x898] sm:$0x3] }
  0x99   :  { %3677 = vmatmul.mubr.f32.vlgmr.msra.gmra.mxu0 %v841_v29  ;;  %3850 = vmatprep.subr.mxu1 %v403_v50  ;;  %v916_v29 = vrot.slane %v902_v22, %v8803_v11  ;;  %v218_v50 = vld [vmem:[#allocation2 + $0x268] sm:$0xff]  ;;  %v228_v22 = vld [vmem:[#allocation2 + $0x2b8] sm:$0xff] }
  0x9a   :  { %3781 = vmatpush1.xpose.msra.mxu0 %v400_v52  ;;  %3816 = vmatprep.mubr.f32.mxu0 %v866_v51  ;;  %v936_v52 = vcombine.high %v111_v45, %v111_v45 }
  0x9b   :  { %3747 = vmatmul.mubr.f32.vlgmr.msra.gmra.mxu1 %v848_v32  ;;  %3782 = vmatprep.subr.mxu0 %v202_v53  ;;  %v415_v32 = vld [vmem:[#allocation2 + $0x890] sm:$0x3]  ;;  %v918_v36 = vcombine.high %v916_v29, %v916_v29  ;;  %v418_v53 = vld [vmem:[#allocation2 + $0x8a8] sm:$0x3] }
  0x9c   :  { %3851 = vmatpush1.xpose.msra.mxu1 %v402_v56  ;;  %3886 = vmatprep.mubr.f32.mxu1 %v867_v54  ;;  %v62_v54 = vld [vmem:[%s9061_s0 + $0xa8] sm:$0xff]  ;;  %v943_v56 = vrot.slane %v111_v45, %v8803_v11 }
  0x9d   :  { %3852 = vmatprep.subr.mxu1 %v204_v58  ;;  %v421_v58 = vld [vmem:[#allocation2 + $0x8c0] sm:$0x3] }
  0x9e   :  { %3783 = vmatpush1.xpose.msra.mxu0 %v201_v60  ;;  %v112_v60 = vmax.f32 %v62_v54, 0.0  ;;  %v951_v63 = vcombine.high %v943_v56, %v943_v56  ;;  %v233_v54 = vld [vmem:[#allocation2 + $0x2e0] sm:$0xff] }
  0x9f   :  { %3920 = vmatprep.subr.mxu0 %v405_v61  ;;  %v219_v61 = vld [vmem:[#allocation2 + $0x270] sm:$0xff] }
  0xa0   :  { %3853 = vmatpush1.xpose.msra.mxu1 %v203_v0  ;;  %v420_v0 = vld [vmem:[#allocation2 + $0x8b8] sm:$0x3] }
  0xa1   :  { %3817 = vmatmul.mubr.f32.vlgmr.msra.gmra.mxu0 %v858_v44  ;;  %3990 = vmatprep.subr.mxu1 %v407_v1  ;;  %v933_v44 = vrot.slane %v919_v37, %v8803_v11  ;;  %v222_v1 = vld [vmem:[#allocation2 + $0x288] sm:$0xff]  ;;  %v232_v37 = vld [vmem:[#allocation2 + $0x2d8] sm:$0xff] }
  0xa2   :  { %3921 = vmatpush1.xpose.msra.mxu0 %v404_v3  ;;  %3956 = vmatprep.mubr.f32.mxu0 %v883_v2  ;;  %v953_v3 = vcombine.high %v112_v60, %v112_v60 }
  0xa3   :  { %3887 = vmatmul.mubr.f32.vlgmr.msra.gmra.mxu1 %v865_v47  ;;  %3922 = vmatprep.subr.mxu0 %v206_v4  ;;  %v419_v47 = vld [vmem:[#allocation2 + $0x8b0] sm:$0x3]  ;;  %v935_v51 = vcombine.high %v933_v44, %v933_v44  ;;  %v422_v4 = vld [vmem:[#allocation2 + $0x8c8] sm:$0x3] }
  0xa4   :  { %3991 = vmatpush1.xpose.msra.mxu1 %v406_v7  ;;  %4026 = vmatprep.mubr.f32.mxu1 %v884_v5  ;;  %v63_v5 = vld [vmem:[%s9061_s0 + $0xb0] sm:$0xff]  ;;  %v960_v7 = vrot.slane %v112_v60, %v8803_v11 }
  0xa5   :  { %3992 = vmatprep.subr.mxu1 %v208_v9  ;;  %v425_v9 = vld [vmem:[#allocation2 + $0x8e0] sm:$0x3] }
  0xa6   :  { %3923 = vmatpush1.xpose.msra.mxu0 %v205_v12  ;;  %v113_v12 = vmax.f32 %v63_v5, 0.0  ;;  %v968_v15 = vcombine.high %v960_v7, %v960_v7  ;;  %v237_v5 = vld [vmem:[#allocation2 + $0x300] sm:$0xff] }
  0xa7   :  { %4060 = vmatprep.subr.mxu0 %v409_v13  ;;  %v223_v13 = vld [vmem:[#allocation2 + $0x290] sm:$0xff] }
  0xa8   :  { %3993 = vmatpush1.xpose.msra.mxu1 %v207_v16  ;;  %v424_v16 = vld [vmem:[#allocation2 + $0x8d8] sm:$0x3] }
  0xa9   :  { %3957 = vmatmul.mubr.f32.vlgmr.msra.gmra.mxu0 %v875_v59  ;;  %4130 = vmatprep.subr.mxu1 %v411_v17  ;;  %v950_v59 = vrot.slane %v936_v52, %v8803_v11  ;;  %v226_v17 = vld [vmem:[#allocation2 + $0x2a8] sm:$0xff]  ;;  %v236_v52 = vld [vmem:[#allocation2 + $0x2f8] sm:$0xff] }
  0xaa   :  { %4061 = vmatpush1.xpose.msra.mxu0 %v408_v19  ;;  %4096 = vmatprep.mubr.f32.mxu0 %v900_v18  ;;  %v970_v19 = vcombine.high %v113_v12, %v113_v12 }
  0xab   :  { %4027 = vmatmul.mubr.f32.vlgmr.msra.gmra.mxu1 %v882_v62  ;;  %4062 = vmatprep.subr.mxu0 %v210_v20  ;;  %v423_v62 = vld [vmem:[#allocation2 + $0x8d0] sm:$0x3]  ;;  %v952_v2 = vcombine.high %v950_v59, %v950_v59  ;;  %v426_v20 = vld [vmem:[#allocation2 + $0x8e8] sm:$0x3] }
  0xac   :  { %4131 = vmatpush1.xpose.msra.mxu1 %v410_v23  ;;  %4166 = vmatprep.mubr.f32.mxu1 %v901_v21  ;;  %v64_v21 = vld [vmem:[%s9061_s0 + $0xb8] sm:$0xff]  ;;  %v977_v23 = vrot.slane %v113_v12, %v8803_v11 }
  0xad   :  { %4132 = vmatprep.subr.mxu1 %v212_v25  ;;  %v429_v25 = vld [vmem:[#allocation2 + $0x900] sm:$0x3] }
  0xae   :  { %4063 = vmatpush1.xpose.msra.mxu0 %v209_v27  ;;  %v114_v27 = vmax.f32 %v64_v21, 0.0  ;;  %v985_v30 = vcombine.high %v977_v23, %v977_v23 }
  0xaf   :  { %4200 = vmatprep.subr.mxu0 %v413_v28  ;;  %v227_v28 = vld [vmem:[#allocation2 + $0x2b0] sm:$0xff] }
  0xb0   :  { %4133 = vmatpush1.xpose.msra.mxu1 %v211_v31  ;;  %v428_v31 = vld [vmem:[#allocation2 + $0x8f8] sm:$0x3] }
  0xb1   :  { %4097 = vmatmul.mubr.f32.vlgmr.msra.gmra.mxu0 %v892_v10  ;;  %4270 = vmatprep.subr.mxu1 %v415_v32  ;;  %v967_v10 = vrot.slane %v953_v3, %v8803_v11  ;;  %v230_v32 = vld [vmem:[#allocation2 + $0x2c8] sm:$0xff]  ;;  %v240_v3 = vld [vmem:[#allocation2 + $0x318] sm:$0xff] }
  0xb2   :  { %4201 = vmatpush1.xpose.msra.mxu0 %v412_v34  ;;  %4236 = vmatprep.mubr.f32.mxu0 %v917_v33  ;;  %v987_v34 = vcombine.high %v114_v27, %v114_v27 }
  0xb3   :  { %4167 = vmatmul.mubr.f32.vlgmr.msra.gmra.mxu1 %v899_v14  ;;  %4202 = vmatprep.subr.mxu0 %v214_v35  ;;  %v427_v14 = vld [vmem:[#allocation2 + $0x8f0] sm:$0x3]  ;;  %v969_v18 = vcombine.high %v967_v10, %v967_v10  ;;  %v430_v35 = vld [vmem:[#allocation2 + $0x908] sm:$0x3] }
  0xb4   :  { %4271 = vmatpush1.xpose.msra.mxu1 %v414_v38  ;;  %4306 = vmatprep.mubr.f32.mxu1 %v918_v36  ;;  %v65_v36 = vld [vmem:[%s9061_s0 + $0xc0] sm:$0xff]  ;;  %v994_v38 = vrot.slane %v114_v27, %v8803_v11 }
  0xb5   :  { %4272 = vmatprep.subr.mxu1 %v216_v40  ;;  %v433_v40 = vld [vmem:[#allocation2 + $0x920] sm:$0x3] }
  0xb6   :  { %4203 = vmatpush1.xpose.msra.mxu0 %v213_v42  ;;  %v115_v42 = vmax.f32 %v65_v36, 0.0  ;;  %v1002_v45 = vcombine.high %v994_v38, %v994_v38  ;;  %v246_v36 = vld [vmem:[#allocation2 + $0x348] sm:$0xff] }
  0xb7   :  { %4340 = vmatprep.subr.mxu0 %v417_v43  ;;  %v231_v43 = vld [vmem:[#allocation2 + $0x2d0] sm:$0xff] }
  0xb8   :  { %4273 = vmatpush1.xpose.msra.mxu1 %v215_v46  ;;  %v432_v46 = vld [vmem:[#allocation2 + $0x918] sm:$0x3] }
  0xb9   :  { %4237 = vmatmul.mubr.f32.vlgmr.msra.gmra.mxu0 %v909_v26  ;;  %4410 = vmatprep.subr.mxu1 %v419_v47  ;;  %v984_v26 = vrot.slane %v970_v19, %v8803_v11  ;;  %v234_v47 = vld [vmem:[#allocation2 + $0x2e8] sm:$0xff] }
  0xba   :  { %4341 = vmatpush1.xpose.msra.mxu0 %v416_v49  ;;  %4376 = vmatprep.mubr.f32.mxu0 %v934_v48  ;;  %v1004_v49 = vcombine.high %v115_v42, %v115_v42  ;;  %v442_v19 = vld [vmem:[#allocation2 + $0x968] sm:$0x3] }
  0xbb   :  { %4307 = vmatmul.mubr.f32.vlgmr.msra.gmra.mxu1 %v916_v29  ;;  %4342 = vmatprep.subr.mxu0 %v218_v50  ;;  %v431_v29 = vld [vmem:[#allocation2 + $0x910] sm:$0x3]  ;;  %v986_v33 = vcombine.high %v984_v26, %v984_v26  ;;  %v434_v50 = vld [vmem:[#allocation2 + $0x928] sm:$0x3] }
  0xbc   :  { %4411 = vmatpush1.xpose.msra.mxu1 %v418_v53  ;;  %4446 = vmatprep.mubr.f32.mxu1 %v935_v51  ;;  %v66_v51 = vld [vmem:[%s9061_s0 + $0xc8] sm:$0xff]  ;;  %v1011_v53 = vrot.slane %v115_v42, %v8803_v11 }
  0xbd   :  { %4412 = vmatprep.subr.mxu1 %v220_v55  ;;  %v437_v55 = vld [vmem:[#allocation2 + $0x940] sm:$0x3] }
  0xbe   :  { %4343 = vmatpush1.xpose.msra.mxu0 %v217_v57  ;;  %v116_v57 = vmax.f32 %v66_v51, 0.0  ;;  %v1019_v60 = vcombine.high %v1011_v53, %v1011_v53 }
  0xbf   :  { %4480 = vmatprep.subr.mxu0 %v421_v58  ;;  %v235_v58 = vld [vmem:[#allocation2 + $0x2f0] sm:$0xff] }
  0xc0   :  { %4413 = vmatpush1.xpose.msra.mxu1 %v219_v61  ;;  %v436_v61 = vld [vmem:[#allocation2 + $0x938] sm:$0x3] }
  0xc1   :  { %4377 = vmatmul.mubr.f32.vlgmr.msra.gmra.mxu0 %v926_v41  ;;  %4550 = vmatprep.subr.mxu1 %v423_v62  ;;  %v1001_v41 = vrot.slane %v987_v34, %v8803_v11  ;;  %v238_v62 = vld [vmem:[#allocation2 + $0x308] sm:$0xff] }
  0xc2   :  { %4481 = vmatpush1.xpose.msra.mxu0 %v420_v0  ;;  %4516 = vmatprep.mubr.f32.mxu0 %v951_v63  ;;  %v1021_v0 = vcombine.high %v116_v57, %v116_v57 }
  0xc3   :  { %4447 = vmatmul.mubr.f32.vlgmr.msra.gmra.mxu1 %v933_v44  ;;  %4482 = vmatprep.subr.mxu0 %v222_v1  ;;  %v435_v44 = vld [vmem:[#allocation2 + $0x930] sm:$0x3]  ;;  %v1003_v48 = vcombine.high %v1001_v41, %v1001_v41  ;;  %v438_v1 = vld [vmem:[#allocation2 + $0x948] sm:$0x3] }
  0xc4   :  { %4551 = vmatpush1.xpose.msra.mxu1 %v422_v4  ;;  %4586 = vmatprep.mubr.f32.mxu1 %v952_v2  ;;  %v67_v2 = vld [vmem:[%s9061_s0 + $0xd0] sm:$0xff]  ;;  %v1028_v4 = vrot.slane %v116_v57, %v8803_v11  ;;  %v250_v57 = vld [vmem:[#allocation2 + $0x368] sm:$0xff] }
  0xc5   :  { %4552 = vmatprep.subr.mxu1 %v224_v6  ;;  %v441_v6 = vld [vmem:[#allocation2 + $0x960] sm:$0x3] }
  0xc6   :  { %4483 = vmatpush1.xpose.msra.mxu0 %v221_v8  ;;  %v117_v8 = vmax.f32 %v67_v2, 0.0  ;;  %v1036_v12 = vcombine.high %v1028_v4, %v1028_v4 }
  0xc7   :  { %4620 = vmatprep.subr.mxu0 %v425_v9  ;;  %v239_v9 = vld [vmem:[#allocation2 + $0x310] sm:$0xff] }
  0xc8   :  { %4553 = vmatpush1.xpose.msra.mxu1 %v223_v13  ;;  %v8676_v13 = vld [vmem:[#allocation5] ss:$0 sm:$0xff] }
  0xc9   :  { %4517 = vmatmul.mubr.f32.vlgmr.msra.gmra.mxu0 %v943_v56  ;;  %4690 = vmatprep.subr.mxu1 %v427_v14  ;;  %v1018_v56 = vrot.slane %v1004_v49, %v8803_v11  ;;  %v440_v14 = vld [vmem:[#allocation2 + $0x958] sm:$0x3]  ;;  %v449_v49 = vld [vmem:[#allocation2 + $0x9a0] sm:$0x3] }
  0xca   :  { %4621 = vmatpush1.xpose.msra.mxu0 %v424_v16  ;;  %4656 = vmatprep.mubr.f32.mxu0 %v968_v15  ;;  %v242_v15 = vld [vmem:[#allocation2 + $0x328] sm:$0xff] }
  0xcb   :  { %4587 = vmatmul.mubr.f32.vlgmr.msra.gmra.mxu1 %v950_v59  ;;  %4622 = vmatprep.subr.mxu0 %v226_v17  ;;  %v439_v59 = vld [vmem:[#allocation2 + $0x950] sm:$0x3]  ;;  %v1020_v63 = vcombine.high %v1018_v56, %v1018_v56  ;;  %v1038_v17 = vcombine.high %v117_v8, %v117_v8 }
  0xcc   :  { %4691 = vmatpush1.xpose.msra.mxu1 %v426_v20  ;;  %4726 = vmatprep.mubr.f32.mxu1 %v969_v18  ;;  %v68_v20 = vld [vmem:[%s9061_s0 + $0xd8] sm:$0xff] }
  0xcd   :  { %4692 = vmatprep.subr.mxu1 %v228_v22  ;;  %v244_v22 = vld [vmem:[#allocation2 + $0x338] sm:$0xff] }
  0xce   :  { %4623 = vmatpush1.xpose.msra.mxu0 %v225_v24 }
  0xcf   :  { %4760 = vmatprep.subr.mxu0 %v429_v25 }
  0xd0   :  { %4693 = vmatpush1.xpose.msra.mxu1 %v227_v28  ;;  %v445_v28 = vld [vmem:[#allocation2 + $0x980] sm:$0x3] }
  0xd1   :  { %4657 = vmatmul.mubr.f32.vlgmr.msra.gmra.mxu0 %v960_v7  ;;  %4830 = vmatprep.subr.mxu1 %v431_v29  ;;  %v1035_v7 = vrot.slane %v1021_v0, %v8803_v11  ;;  %v1052_v29 = vrot.slane %v1038_v17, %v8803_v11  ;;  %v252_v0 = vld [vmem:[#allocation2 + $0x378] sm:$0xff] }
  0xd2   :  { %4761 = vmatpush1.xpose.msra.mxu0 %v428_v31  ;;  %4796 = vmatprep.mubr.f32.mxu0 %v985_v30  ;;  %v118_v30 = vmax.f32 %v68_v20, 0.0  ;;  %v71_v20 = vld [vmem:[%s9061_s0 + $0xf0] sm:$0xff] }
  0xd3   :  { %4727 = vmatmul.mubr.f32.vlgmr.msra.gmra.mxu1 %v967_v10  ;;  %4762 = vmatprep.subr.mxu0 %v230_v32  ;;  %v443_v10 = vld [vmem:[#allocation2 + $0x970] sm:$0x3]  ;;  %v1037_v16 = vcombine.high %v1035_v7, %v1035_v7 }
  0xd4   :  { %4831 = vmatpush1.xpose.msra.mxu1 %v430_v35  ;;  %4866 = vmatprep.mubr.f32.mxu1 %v986_v33  ;;  %v243_v32 = vld [vmem:[#allocation2 + $0x330] sm:$0xff]  ;;  %v444_v35 = vld [vmem:[#allocation2 + $0x978] sm:$0x3] }
  0xd5   :  { %4832 = vmatprep.subr.mxu1 %v232_v37  ;;  %v447_v33 = vld [vmem:[#allocation2 + $0x990] sm:$0x3]  ;;  %v1054_v37 = vcombine.high %v1052_v29, %v1052_v29 }
  0xd6   :  { %4763 = vmatpush1.xpose.msra.mxu0 %v229_v39 }
  0xd7   :  { %4900 = vmatprep.subr.mxu0 %v433_v40  ;;  %v446_v40 = vld [vmem:[#allocation2 + $0x988] sm:$0x3] }
  0xd8   :  { %4833 = vmatpush1.xpose.msra.mxu1 %v231_v43  ;;  %v248_v43 = vld [vmem:[#allocation2 + $0x358] sm:$0xff] }
  0xd9   :  { %4797 = vmatmul.mubr.f32.vlgmr.msra.gmra.mxu0 %v977_v23  ;;  %4970 = vmatprep.subr.mxu1 %v435_v44  ;;  %v1045_v23 = vrot.slane %v117_v8, %v8803_v11  ;;  %v1062_v44 = vrot.slane %v118_v30, %v8803_v11 }
  0xda   :  { %4901 = vmatpush1.xpose.msra.mxu0 %v432_v46  ;;  %4936 = vmatprep.mubr.f32.mxu0 %v1002_v45 }
  0xdb   :  { %4867 = vmatmul.mubr.f32.vlgmr.msra.gmra.mxu1 %v984_v26  ;;  %4902 = vmatprep.subr.mxu0 %v234_v47  ;;  %v241_v26 = vld [vmem:[#allocation2 + $0x320] sm:$0xff]  ;;  %v1053_v34 = vcombine.high %v1045_v23, %v1045_v23 }
  0xdc   :  { %4971 = vmatpush1.xpose.msra.mxu1 %v434_v50  ;;  %5006 = vmatprep.mubr.f32.mxu1 %v1003_v48  ;;  %v245_v47 = vld [vmem:[#allocation2 + $0x340] sm:$0xff] }
  0xdd   :  { %4972 = vmatprep.subr.mxu1 %v236_v52 }
  0xde   :  { %4903 = vmatpush1.xpose.msra.mxu0 %v233_v54  ;;  %v451_v54 = vld [vmem:[#allocation2 + $0x9b0] sm:$0x3] }
  0xdf   :  { %5040 = vmatprep.subr.mxu0 %v437_v55  ;;  %v1070_v55 = vcombine.high %v1062_v44, %v1062_v44 }
  0xe0   :  { %4973 = vmatpush1.xpose.msra.mxu1 %v235_v58 }
  0xe1   :  { %4937 = vmatmul.mubr.f32.vlgmr.msra.gmra.mxu0 %v994_v38  ;;  %5110 = vmatprep.subr.mxu1 %v439_v59  ;;  %v1055_v38 = vcombine.high %v118_v30, %v118_v30  ;;  %v121_v30 = vmax.f32 %v71_v20, 0.0  ;;  %v74_v20 = vld [vmem:[%s9061_s0 + $0x108] sm:$0xff] }
  0xe2   :  { %5041 = vmatpush1.xpose.msra.mxu0 %v436_v61  ;;  %5076 = vmatprep.mubr.f32.mxu0 %v1019_v60  ;;  %v450_v61 = vld [vmem:[#allocation2 + $0x9a8] sm:$0x3] }
  0xe3   :  { %5007 = vmatmul.mubr.f32.vlgmr.msra.gmra.mxu1 %v1001_v41  ;;  %5042 = vmatprep.subr.mxu0 %v238_v62  ;;  %v69_v41 = vld [vmem:[%s9061_s0 + $0xe0] sm:$0xff]  ;;  %v1069_v50 = vrot.slane %v1055_v38, %v8803_v11  ;;  %v70_v62 = vld [vmem:[%s9061_s0 + $0xe8] sm:$0xff]  ;;  %v1106_v38 = vcombine.high %v121_v30, %v121_v30 }
  0xe4   :  { %5111 = vmatpush1.xpose.msra.mxu1 %v438_v1  ;;  %5146 = vmatprep.mubr.f32.mxu1 %v1020_v63  ;;  %v119_v51 = vmax.f32 %v69_v41, 0.0  ;;  %v120_v8 = vmax.f32 %v70_v62, 0.0  ;;  %v72_v41 = vld [vmem:[%s9061_s0 + $0xf8] sm:$0xff]  ;;  %v73_v62 = vld [vmem:[%s9061_s0 + $0x100] sm:$0xff] }
  0xe5   :  { %5112 = vmatprep.subr.mxu1 %v240_v3  ;;  %v1071_v58 = vcombine.high %v1069_v50, %v1069_v50 }
  0xe6   :  { %5043 = vmatpush1.xpose.msra.mxu0 %v237_v5  ;;  %v1072_v59 = vcombine.high %v119_v51, %v119_v51  ;;  %v1079_v1 = vrot.slane %v119_v51, %v8803_v11  ;;  %v1089_v17 = vcombine.high %v120_v8, %v120_v8  ;;  %v122_v51 = vmax.f32 %v72_v41, 0.0  ;;  %v75_v41 = vld [vmem:[%s9061_s0 + $0x110] sm:$0xff] }
  0xe7   :  { %5180 = vmatprep.subr.mxu0 %v441_v6  ;;  %v453_v6 = vld [vmem:[#allocation2 + $0x9c0] sm:$0x3] }
  0xe8   :  { %5113 = vmatpush1.xpose.msra.mxu1 %v239_v9 }
  0xe9   :  { %v1718_v18 = vpop.f32.mrf.mxu0  ;;  %5077 = vmatmul.mubr.f32.vlgmr.msra.gmra.mxu0 %v1011_v53  ;;  %5250 = vmatprep.subr.mxu1 %v443_v10  ;;  %v1788_v24 = vpop.f32.mrf.mxu1  ;;  %v247_v53 = vld [vmem:[#allocation2 + $0x350] sm:$0xff] }
  0xea   :  { %v1719_v21 = vadd.f32 %v8676_v13, %v1718_v18  ;;  %5181 = vmatpush1.xpose.msra.mxu0 %v440_v14  ;;  %5216 = vmatprep.mubr.f32.mxu0 %v1036_v12  ;;  %v251_v10 = vld [vmem:[#allocation2 + $0x370] sm:$0xff]  ;;  %v1087_v13 = vcombine.high %v1079_v1, %v1079_v1  ;;  %v452_v14 = vld [vmem:[#allocation2 + $0x9b8] sm:$0x3] }
  0xeb   :  { %5147 = vmatmul.mubr.f32.vlgmr.msra.gmra.mxu1 %v1018_v56  ;;  %v1720_v25 = vpop.f32.mrf.mxu0  ;;  %5182 = vmatprep.subr.mxu0 %v242_v15  ;;  %v1790_v31 = vpop.f32.mrf.mxu1  ;;  %v448_v56 = vld [vmem:[#allocation2 + $0x998] sm:$0x3]  ;;  %v455_v12 = vld [vmem:[#allocation2 + $0x9d0] sm:$0x3]  ;;  %v254_v15 = vld [vmem:[#allocation2 + $0x388] sm:$0xff] }
  0xec   :  { %v1789_v27 = vadd.f32 %v1788_v24, %v1719_v21  ;;  %5251 = vmatpush1.xpose.msra.mxu1 %v442_v19  ;;  %5286 = vmatprep.mubr.f32.mxu1 %v1037_v16  ;;  %v454_v19 = vld [vmem:[#allocation2 + $0x9c8] sm:$0x3] }
  0xed   :  { %5252 = vmatprep.subr.mxu1 %v244_v22  ;;  %v256_v22 = vld [vmem:[#allocation2 + $0x398] sm:$0xff] }
  0xee   :  { %5183 = vmatpush1.xpose.msra.mxu0 %v241_v26  ;;  %v253_v26 = vld [vmem:[#allocation2 + $0x380] sm:$0xff] }
  0xef   :  { %5320 = vmatprep.subr.mxu0 %v445_v28  ;;  %v457_v28 = vld [vmem:[#allocation2 + $0x9e0] sm:$0x3] }
  0xf0   :  { %5253 = vmatpush1.xpose.msra.mxu1 %v243_v32  ;;  %v255_v32 = vld [vmem:[#allocation2 + $0x390] sm:$0xff] }
  0xf1   :  { %v1858_v39 = vpop.f32.mrf.mxu0  ;;  %5217 = vmatmul.mubr.f32.vlgmr.msra.gmra.mxu0 %v1028_v4  ;;  %5390 = vmatprep.subr.mxu1 %v447_v33  ;;  %v1928_v45 = vpop.f32.mrf.mxu1  ;;  %v249_v4 = vld [vmem:[#allocation2 + $0x360] sm:$0xff]  ;;  %v459_v33 = vld [vmem:[#allocation2 + $0x9f0] sm:$0x3] }
  0xf2   :  { %v1859_v42 = vadd.f32 %v1858_v39, %v1789_v27  ;;  %5321 = vmatpush1.xpose.msra.mxu0 %v444_v35  ;;  %5356 = vmatprep.mubr.f32.mxu0 %v1053_v34  ;;  %v456_v35 = vld [vmem:[#allocation2 + $0x9d8] sm:$0x3] }
  0xf3   :  { %5287 = vmatmul.mubr.f32.vlgmr.msra.gmra.mxu1 %v1035_v7  ;;  %v1860_v46 = vpop.f32.mrf.mxu0  ;;  %5322 = vmatprep.subr.mxu0 %v246_v36  ;;  %v1930_v52 = vpop.f32.mrf.mxu1  ;;  %v1086_v7 = vrot.slane %v1072_v59, %v8803_v11  ;;  %v258_v36 = vld [vmem:[#allocation2 + $0x3a8] sm:$0xff]  ;;  %v1123_v59 = vcombine.high %v122_v51, %v122_v51 }
  0xf4   :  { %v1929_v48 = vadd.f32 %v1928_v45, %v1859_v42  ;;  %5391 = vmatpush1.xpose.msra.mxu1 %v446_v40  ;;  %5426 = vmatprep.mubr.f32.mxu1 %v1054_v37  ;;  %v458_v40 = vld [vmem:[#allocation2 + $0x9e8] sm:$0x3] }
  0xf5   :  { %5392 = vmatprep.subr.mxu1 %v248_v43  ;;  %v1088_v16 = vcombine.high %v1086_v7, %v1086_v7  ;;  %v260_v43 = vld [vmem:[#allocation2 + $0x3b8] sm:$0xff] }
  0xf6   :  { %5323 = vmatpush1.xpose.msra.mxu0 %v245_v47  ;;  %v257_v47 = vld [vmem:[#allocation2 + $0x3a0] sm:$0xff] }
  0xf7   :  { %5460 = vmatprep.subr.mxu0 %v449_v49  ;;  %v461_v49 = vld [vmem:[#allocation2 + $0xa00] sm:$0x3] }
  0xf8   :  { %5393 = vmatpush1.xpose.msra.mxu1 %v247_v53  ;;  %v259_v53 = vld [vmem:[#allocation2 + $0x3b0] sm:$0xff] }
  0xf9   :  { %v1998_v60 = vpop.f32.mrf.mxu0  ;;  %5357 = vmatmul.mubr.f32.vlgmr.msra.gmra.mxu0 %v1045_v23  ;;  %5530 = vmatprep.subr.mxu1 %v451_v54  ;;  %v1096_v23 = vrot.slane %v120_v8, %v8803_v11  ;;  %v463_v54 = vld [vmem:[#allocation2 + $0xa10] sm:$0x3]  ;;  %v123_v8 = vmax.f32 %v73_v62, 0.0  ;;  %v76_v62 = vld [vmem:[%s9061_s0 + $0x118] sm:$0xff] }
  0xfa   :  { %v1999_v63 = vadd.f32 %v1998_v60, %v1929_v48  ;;  %5461 = vmatpush1.xpose.msra.mxu0 %v448_v56  ;;  %5496 = vmatprep.mubr.f32.mxu0 %v1070_v55  ;;  %v460_v56 = vld [vmem:[#allocation2 + $0x9f8] sm:$0x3] }
  0xfb   :  { %v2068_v2 = vpop.f32.mrf.mxu1  ;;  %5427 = vmatmul.mubr.f32.vlgmr.msra.gmra.mxu1 %v1052_v29  ;;  %v2000_v3 = vpop.f32.mrf.mxu0  ;;  %5462 = vmatprep.subr.mxu0 %v250_v57  ;;  %v1103_v29 = vrot.slane %v1089_v17, %v8803_v11  ;;  %v1104_v34 = vcombine.high %v1096_v23, %v1096_v23  ;;  %v262_v57 = vld [vmem:[#allocation2 + $0x3c8] sm:$0xff]  ;;  %v1140_v17 = vcombine.high %v123_v8, %v123_v8 }
  0xfc   :  { %v2069_v5 = vadd.f32 %v2068_v2, %v1999_v63  ;;  %5531 = vmatpush1.xpose.msra.mxu1 %v450_v61  ;;  %5566 = vmatprep.mubr.f32.mxu1 %v1071_v58  ;;  %v462_v61 = vld [vmem:[#allocation2 + $0xa08] sm:$0x3] }
  0xfd   :  { %v2070_v9 = vpop.f32.mrf.mxu1  ;;  %5532 = vmatprep.subr.mxu1 %v252_v0  ;;  %v1105_v37 = vcombine.high %v1103_v29, %v1103_v29  ;;  %v264_v0 = vld [vmem:[#allocation2 + $0x3d8] sm:$0xff] }
  0xfe   :  { %5463 = vmatpush1.xpose.msra.mxu0 %v249_v4  ;;  %v261_v4 = vld [vmem:[#allocation2 + $0x3c0] sm:$0xff] }
  0xff   :  { %5600 = vmatprep.subr.mxu0 %v453_v6  ;;  %v465_v6 = vld [vmem:[#allocation2 + $0xa20] sm:$0x3] }
 0x100   :  { %5533 = vmatpush1.xpose.msra.mxu1 %v251_v10  ;;  %v263_v10 = vld [vmem:[#allocation2 + $0x3d0] sm:$0xff] }
 0x101   :  { %v2138_v18 = vpop.f32.mrf.mxu0  ;;  %5497 = vmatmul.mubr.f32.vlgmr.msra.gmra.mxu0 %v1062_v44  ;;  %5670 = vmatprep.subr.mxu1 %v455_v12  ;;  %v1113_v44 = vrot.slane %v121_v30, %v8803_v11  ;;  %v467_v12 = vld [vmem:[#allocation2 + $0xa30] sm:$0x3]  ;;  %v124_v30 = vmax.f32 %v74_v20, 0.0  ;;  %v77_v20 = vld [vmem:[%s9061_s0 + $0x120] sm:$0xff] }
 0x102   :  { %v2139_v21 = vadd.f32 %v2138_v18, %v2069_v5  ;;  %5601 = vmatpush1.xpose.msra.mxu0 %v452_v14  ;;  %5636 = vmatprep.mubr.f32.mxu0 %v1087_v13  ;;  %v464_v14 = vld [vmem:[#allocation2 + $0xa18] sm:$0x3] }
 0x103   :  { %v2208_v24 = vpop.f32.mrf.mxu1  ;;  %5567 = vmatmul.mubr.f32.vlgmr.msra.gmra.mxu1 %v1069_v50  ;;  %v2140_v25 = vpop.f32.mrf.mxu0  ;;  %5602 = vmatprep.subr.mxu0 %v254_v15  ;;  %v1120_v50 = vrot.slane %v1106_v38, %v8803_v11  ;;  %v1121_v55 = vcombine.high %v1113_v44, %v1113_v44  ;;  %v266_v15 = vld [vmem:[#allocation2 + $0x3e8] sm:$0xff]  ;;  %v1157_v38 = vcombine.high %v124_v30, %v124_v30 }
 0x104   :  { %v2209_v27 = vadd.f32 %v2208_v24, %v2139_v21  ;;  %5671 = vmatpush1.xpose.msra.mxu1 %v454_v19  ;;  %5706 = vmatprep.mubr.f32.mxu1 %v1088_v16  ;;  %v466_v19 = vld [vmem:[#allocation2 + $0xa28] sm:$0x3] }
 0x105   :  { %v2210_v31 = vpop.f32.mrf.mxu1  ;;  %5672 = vmatprep.subr.mxu1 %v256_v22  ;;  %v1122_v58 = vcombine.high %v1120_v50, %v1120_v50  ;;  %v268_v22 = vld [vmem:[#allocation2 + $0x3f8] sm:$0xff] }
 0x106   :  { %5603 = vmatpush1.xpose.msra.mxu0 %v253_v26  ;;  %v265_v26 = vld [vmem:[#allocation2 + $0x3e0] sm:$0xff] }
 0x107   :  { %5740 = vmatprep.subr.mxu0 %v457_v28  ;;  %v469_v28 = vld [vmem:[#allocation2 + $0xa40] sm:$0x3] }
 0x108   :  { %5673 = vmatpush1.xpose.msra.mxu1 %v255_v32  ;;  %v267_v32 = vld [vmem:[#allocation2 + $0x3f0] sm:$0xff] }
 0x109   :  { %v2278_v39 = vpop.f32.mrf.mxu0  ;;  %5637 = vmatmul.mubr.f32.vlgmr.msra.gmra.mxu0 %v1079_v1  ;;  %5810 = vmatprep.subr.mxu1 %v459_v33  ;;  %v1130_v1 = vrot.slane %v122_v51, %v8803_v11  ;;  %v471_v33 = vld [vmem:[#allocation2 + $0xa50] sm:$0x3]  ;;  %v125_v51 = vmax.f32 %v75_v41, 0.0  ;;  %v78_v41 = vld [vmem:[%s9061_s0 + $0x128] sm:$0xff] }
 0x10a   :  { %v2279_v42 = vadd.f32 %v2278_v39, %v2209_v27  ;;  %5741 = vmatpush1.xpose.msra.mxu0 %v456_v35  ;;  %5776 = vmatprep.mubr.f32.mxu0 %v1104_v34  ;;  %v468_v35 = vld [vmem:[#allocation2 + $0xa38] sm:$0x3] }
 0x10b   :  { %v2348_v45 = vpop.f32.mrf.mxu1  ;;  %5707 = vmatmul.mubr.f32.vlgmr.msra.gmra.mxu1 %v1086_v7  ;;  %v2280_v46 = vpop.f32.mrf.mxu0  ;;  %5742 = vmatprep.subr.mxu0 %v258_v36  ;;  %v1137_v7 = vrot.slane %v1123_v59, %v8803_v11  ;;  %v1138_v13 = vcombine.high %v1130_v1, %v1130_v1  ;;  %v270_v36 = vld [vmem:[#allocation2 + $0x408] sm:$0xff]  ;;  %v1174_v59 = vcombine.high %v125_v51, %v125_v51 }
 0x10c   :  { %v2349_v48 = vadd.f32 %v2348_v45, %v2279_v42  ;;  %5811 = vmatpush1.xpose.msra.mxu1 %v458_v40  ;;  %5846 = vmatprep.mubr.f32.mxu1 %v1105_v37  ;;  %v470_v40 = vld [vmem:[#allocation2 + $0xa48] sm:$0x3] }
 0x10d   :  { %v2350_v52 = vpop.f32.mrf.mxu1  ;;  %5812 = vmatprep.subr.mxu1 %v260_v43  ;;  %v1139_v16 = vcombine.high %v1137_v7, %v1137_v7  ;;  %v272_v43 = vld [vmem:[#allocation2 + $0x418] sm:$0xff] }
 0x10e   :  { %5743 = vmatpush1.xpose.msra.mxu0 %v257_v47  ;;  %v269_v47 = vld [vmem:[#allocation2 + $0x400] sm:$0xff] }
 0x10f   :  { %5880 = vmatprep.subr.mxu0 %v461_v49  ;;  %v473_v49 = vld [vmem:[#allocation2 + $0xa60] sm:$0x3] }
 0x110   :  { %5813 = vmatpush1.xpose.msra.mxu1 %v259_v53  ;;  %v271_v53 = vld [vmem:[#allocation2 + $0x410] sm:$0xff] }
 0x111   :  { %v2418_v60 = vpop.f32.mrf.mxu0  ;;  %5777 = vmatmul.mubr.f32.vlgmr.msra.gmra.mxu0 %v1096_v23  ;;  %5950 = vmatprep.subr.mxu1 %v463_v54  ;;  %v1147_v23 = vrot.slane %v123_v8, %v8803_v11  ;;  %v475_v54 = vld [vmem:[#allocation2 + $0xa70] sm:$0x3]  ;;  %v126_v8 = vmax.f32 %v76_v62, 0.0 }
 0x112   :  { %v2419_v63 = vadd.f32 %v2418_v60, %v2349_v48  ;;  %5881 = vmatpush1.xpose.msra.mxu0 %v460_v56  ;;  %5916 = vmatprep.mubr.f32.mxu0 %v1121_v55  ;;  %v472_v56 = vld [vmem:[#allocation2 + $0xa58] sm:$0x3]  ;;  %v79_v62 = vld [vmem:[%s9061_s0 + $0x130] sm:$0xff] }
 0x113   :  { %v2488_v2 = vpop.f32.mrf.mxu1  ;;  %5847 = vmatmul.mubr.f32.vlgmr.msra.gmra.mxu1 %v1103_v29  ;;  %v2420_v3 = vpop.f32.mrf.mxu0  ;;  %5882 = vmatprep.subr.mxu0 %v262_v57  ;;  %v1154_v29 = vrot.slane %v1140_v17, %v8803_v11  ;;  %v1155_v34 = vcombine.high %v1147_v23, %v1147_v23  ;;  %v274_v57 = vld [vmem:[#allocation2 + $0x428] sm:$0xff]  ;;  %v1191_v17 = vcombine.high %v126_v8, %v126_v8 }
 0x114   :  { %v2489_v5 = vadd.f32 %v2488_v2, %v2419_v63  ;;  %5951 = vmatpush1.xpose.msra.mxu1 %v462_v61  ;;  %5986 = vmatprep.mubr.f32.mxu1 %v1122_v58  ;;  %v474_v61 = vld [vmem:[#allocation2 + $0xa68] sm:$0x3] }
 0x115   :  { %v2490_v9 = vpop.f32.mrf.mxu1  ;;  %5952 = vmatprep.subr.mxu1 %v264_v0  ;;  %v1156_v37 = vcombine.high %v1154_v29, %v1154_v29  ;;  %v276_v0 = vld [vmem:[#allocation2 + $0x438] sm:$0xff] }
 0x116   :  { %5883 = vmatpush1.xpose.msra.mxu0 %v261_v4  ;;  %v273_v4 = vld [vmem:[#allocation2 + $0x420] sm:$0xff] }
 0x117   :  { %6020 = vmatprep.subr.mxu0 %v465_v6  ;;  %v477_v6 = vld [vmem:[#allocation2 + $0xa80] sm:$0x3] }
 0x118   :  { %5953 = vmatpush1.xpose.msra.mxu1 %v263_v10  ;;  %v275_v10 = vld [vmem:[#allocation2 + $0x430] sm:$0xff] }
 0x119   :  { %v2558_v18 = vpop.f32.mrf.mxu0  ;;  %5917 = vmatmul.mubr.f32.vlgmr.msra.gmra.mxu0 %v1113_v44  ;;  %6090 = vmatprep.subr.mxu1 %v467_v12  ;;  %v1164_v44 = vrot.slane %v124_v30, %v8803_v11  ;;  %v479_v12 = vld [vmem:[#allocation2 + $0xa90] sm:$0x3]  ;;  %v127_v30 = vmax.f32 %v77_v20, 0.0  ;;  %v80_v20 = vld [vmem:[%s9061_s0 + $0x138] sm:$0xff] }
 0x11a   :  { %v2559_v21 = vadd.f32 %v2558_v18, %v2489_v5  ;;  %6021 = vmatpush1.xpose.msra.mxu0 %v464_v14  ;;  %6056 = vmatprep.mubr.f32.mxu0 %v1138_v13  ;;  %v476_v14 = vld [vmem:[#allocation2 + $0xa78] sm:$0x3] }
 0x11b   :  { %v2628_v24 = vpop.f32.mrf.mxu1  ;;  %5987 = vmatmul.mubr.f32.vlgmr.msra.gmra.mxu1 %v1120_v50  ;;  %v2560_v25 = vpop.f32.mrf.mxu0  ;;  %6022 = vmatprep.subr.mxu0 %v266_v15  ;;  %v1171_v50 = vrot.slane %v1157_v38, %v8803_v11  ;;  %v1172_v55 = vcombine.high %v1164_v44, %v1164_v44  ;;  %v278_v15 = vld [vmem:[#allocation2 + $0x448] sm:$0xff]  ;;  %v1208_v38 = vcombine.high %v127_v30, %v127_v30 }
 0x11c   :  { %v2629_v27 = vadd.f32 %v2628_v24, %v2559_v21  ;;  %6091 = vmatpush1.xpose.msra.mxu1 %v466_v19  ;;  %6126 = vmatprep.mubr.f32.mxu1 %v1139_v16  ;;  %v478_v19 = vld [vmem:[#allocation2 + $0xa88] sm:$0x3] }
 0x11d   :  { %v2630_v31 = vpop.f32.mrf.mxu1  ;;  %6092 = vmatprep.subr.mxu1 %v268_v22  ;;  %v1173_v58 = vcombine.high %v1171_v50, %v1171_v50  ;;  %v280_v22 = vld [vmem:[#allocation2 + $0x458] sm:$0xff] }
 0x11e   :  { %6023 = vmatpush1.xpose.msra.mxu0 %v265_v26  ;;  %v277_v26 = vld [vmem:[#allocation2 + $0x440] sm:$0xff] }
 0x11f   :  { %6160 = vmatprep.subr.mxu0 %v469_v28  ;;  %v481_v28 = vld [vmem:[#allocation2 + $0xaa0] sm:$0x3] }
 0x120   :  { %6093 = vmatpush1.xpose.msra.mxu1 %v267_v32  ;;  %v279_v32 = vld [vmem:[#allocation2 + $0x450] sm:$0xff] }
 0x121   :  { %v2698_v39 = vpop.f32.mrf.mxu0  ;;  %6057 = vmatmul.mubr.f32.vlgmr.msra.gmra.mxu0 %v1130_v1  ;;  %6230 = vmatprep.subr.mxu1 %v471_v33  ;;  %v1181_v1 = vrot.slane %v125_v51, %v8803_v11  ;;  %v483_v33 = vld [vmem:[#allocation2 + $0xab0] sm:$0x3]  ;;  %v128_v51 = vmax.f32 %v78_v41, 0.0  ;;  %v81_v41 = vld [vmem:[%s9061_s0 + $0x140] sm:$0xff] }
 0x122   :  { %v2699_v42 = vadd.f32 %v2698_v39, %v2629_v27  ;;  %6161 = vmatpush1.xpose.msra.mxu0 %v468_v35  ;;  %6196 = vmatprep.mubr.f32.mxu0 %v1155_v34  ;;  %v480_v35 = vld [vmem:[#allocation2 + $0xa98] sm:$0x3] }
 0x123   :  { %v2768_v45 = vpop.f32.mrf.mxu1  ;;  %6127 = vmatmul.mubr.f32.vlgmr.msra.gmra.mxu1 %v1137_v7  ;;  %v2700_v46 = vpop.f32.mrf.mxu0  ;;  %6162 = vmatprep.subr.mxu0 %v270_v36  ;;  %v1188_v7 = vrot.slane %v1174_v59, %v8803_v11  ;;  %v1189_v13 = vcombine.high %v1181_v1, %v1181_v1  ;;  %v282_v36 = vld [vmem:[#allocation2 + $0x468] sm:$0xff]  ;;  %v1225_v59 = vcombine.high %v128_v51, %v128_v51 }
 0x124   :  { %v2769_v48 = vadd.f32 %v2768_v45, %v2699_v42  ;;  %6231 = vmatpush1.xpose.msra.mxu1 %v470_v40  ;;  %6266 = vmatprep.mubr.f32.mxu1 %v1156_v37  ;;  %v482_v40 = vld [vmem:[#allocation2 + $0xaa8] sm:$0x3] }
 0x125   :  { %v2770_v52 = vpop.f32.mrf.mxu1  ;;  %6232 = vmatprep.subr.mxu1 %v272_v43  ;;  %v1190_v16 = vcombine.high %v1188_v7, %v1188_v7  ;;  %v284_v43 = vld [vmem:[#allocation2 + $0x478] sm:$0xff] }
 0x126   :  { %6163 = vmatpush1.xpose.msra.mxu0 %v269_v47  ;;  %v281_v47 = vld [vmem:[#allocation2 + $0x460] sm:$0xff] }
 0x127   :  { %6300 = vmatprep.subr.mxu0 %v473_v49  ;;  %v485_v49 = vld [vmem:[#allocation2 + $0xac0] sm:$0x3] }
 0x128   :  { %6233 = vmatpush1.xpose.msra.mxu1 %v271_v53  ;;  %v283_v53 = vld [vmem:[#allocation2 + $0x470] sm:$0xff] }
 0x129   :  { %v2838_v60 = vpop.f32.mrf.mxu0  ;;  %6197 = vmatmul.mubr.f32.vlgmr.msra.gmra.mxu0 %v1147_v23  ;;  %6370 = vmatprep.subr.mxu1 %v475_v54  ;;  %v1198_v23 = vrot.slane %v126_v8, %v8803_v11  ;;  %v487_v54 = vld [vmem:[#allocation2 + $0xad0] sm:$0x3]  ;;  %v129_v8 = vmax.f32 %v79_v62, 0.0  ;;  %v82_v62 = vld [vmem:[%s9061_s0 + $0x148] sm:$0xff] }
 0x12a   :  { %v2839_v63 = vadd.f32 %v2838_v60, %v2769_v48  ;;  %6301 = vmatpush1.xpose.msra.mxu0 %v472_v56  ;;  %6336 = vmatprep.mubr.f32.mxu0 %v1172_v55  ;;  %v484_v56 = vld [vmem:[#allocation2 + $0xab8] sm:$0x3] }
 0x12b   :  { %v2908_v2 = vpop.f32.mrf.mxu1  ;;  %6267 = vmatmul.mubr.f32.vlgmr.msra.gmra.mxu1 %v1154_v29  ;;  %v2840_v3 = vpop.f32.mrf.mxu0  ;;  %6302 = vmatprep.subr.mxu0 %v274_v57  ;;  %v1205_v29 = vrot.slane %v1191_v17, %v8803_v11  ;;  %v1206_v34 = vcombine.high %v1198_v23, %v1198_v23  ;;  %v286_v57 = vld [vmem:[#allocation2 + $0x488] sm:$0xff]  ;;  %v1242_v17 = vcombine.high %v129_v8, %v129_v8 }
 0x12c   :  { %v2909_v5 = vadd.f32 %v2908_v2, %v2839_v63  ;;  %6371 = vmatpush1.xpose.msra.mxu1 %v474_v61  ;;  %6406 = vmatprep.mubr.f32.mxu1 %v1173_v58  ;;  %v486_v61 = vld [vmem:[#allocation2 + $0xac8] sm:$0x3] }
 0x12d   :  { %v2910_v9 = vpop.f32.mrf.mxu1  ;;  %6372 = vmatprep.subr.mxu1 %v276_v0  ;;  %v1207_v37 = vcombine.high %v1205_v29, %v1205_v29  ;;  %v288_v0 = vld [vmem:[#allocation2 + $0x498] sm:$0xff] }
 0x12e   :  { %6303 = vmatpush1.xpose.msra.mxu0 %v273_v4  ;;  %v285_v4 = vld [vmem:[#allocation2 + $0x480] sm:$0xff] }
 0x12f   :  { %6440 = vmatprep.subr.mxu0 %v477_v6  ;;  %v489_v6 = vld [vmem:[#allocation2 + $0xae0] sm:$0x3] }
 0x130   :  { %6373 = vmatpush1.xpose.msra.mxu1 %v275_v10  ;;  %v287_v10 = vld [vmem:[#allocation2 + $0x490] sm:$0xff] }
 0x131   :  { %v2978_v18 = vpop.f32.mrf.mxu0  ;;  %6337 = vmatmul.mubr.f32.vlgmr.msra.gmra.mxu0 %v1164_v44  ;;  %6510 = vmatprep.subr.mxu1 %v479_v12  ;;  %v1215_v44 = vrot.slane %v127_v30, %v8803_v11  ;;  %v491_v12 = vld [vmem:[#allocation2 + $0xaf0] sm:$0x3]  ;;  %v130_v30 = vmax.f32 %v80_v20, 0.0 }
 0x132   :  { %v2979_v21 = vadd.f32 %v2978_v18, %v2909_v5  ;;  %6441 = vmatpush1.xpose.msra.mxu0 %v476_v14  ;;  %6476 = vmatprep.mubr.f32.mxu0 %v1189_v13  ;;  %v488_v14 = vld [vmem:[#allocation2 + $0xad8] sm:$0x3]  ;;  %v83_v20 = vld [vmem:[%s9061_s0 + $0x150] sm:$0xff] }
 0x133   :  { %v3048_v24 = vpop.f32.mrf.mxu1  ;;  %6407 = vmatmul.mubr.f32.vlgmr.msra.gmra.mxu1 %v1171_v50  ;;  %v2980_v25 = vpop.f32.mrf.mxu0  ;;  %6442 = vmatprep.subr.mxu0 %v278_v15  ;;  %v1222_v50 = vrot.slane %v1208_v38, %v8803_v11  ;;  %v1223_v55 = vcombine.high %v1215_v44, %v1215_v44  ;;  %v290_v15 = vld [vmem:[#allocation2 + $0x4a8] sm:$0xff]  ;;  %v1259_v38 = vcombine.high %v130_v30, %v130_v30 }
 0x134   :  { %v3049_v27 = vadd.f32 %v3048_v24, %v2979_v21  ;;  %6511 = vmatpush1.xpose.msra.mxu1 %v478_v19  ;;  %6546 = vmatprep.mubr.f32.mxu1 %v1190_v16  ;;  %v490_v19 = vld [vmem:[#allocation2 + $0xae8] sm:$0x3] }
 0x135   :  { %v3050_v31 = vpop.f32.mrf.mxu1  ;;  %6512 = vmatprep.subr.mxu1 %v280_v22  ;;  %v1224_v58 = vcombine.high %v1222_v50, %v1222_v50  ;;  %v292_v22 = vld [vmem:[#allocation2 + $0x4b8] sm:$0xff] }
 0x136   :  { %6443 = vmatpush1.xpose.msra.mxu0 %v277_v26  ;;  %v289_v26 = vld [vmem:[#allocation2 + $0x4a0] sm:$0xff] }
 0x137   :  { %6580 = vmatprep.subr.mxu0 %v481_v28  ;;  %v493_v28 = vld [vmem:[#allocation2 + $0xb00] sm:$0x3] }
 0x138   :  { %6513 = vmatpush1.xpose.msra.mxu1 %v279_v32  ;;  %v291_v32 = vld [vmem:[#allocation2 + $0x4b0] sm:$0xff] }
 0x139   :  { %v3118_v39 = vpop.f32.mrf.mxu0  ;;  %6477 = vmatmul.mubr.f32.vlgmr.msra.gmra.mxu0 %v1181_v1  ;;  %6650 = vmatprep.subr.mxu1 %v483_v33  ;;  %v1232_v1 = vrot.slane %v128_v51, %v8803_v11  ;;  %v495_v33 = vld [vmem:[#allocation2 + $0xb10] sm:$0x3]  ;;  %v131_v51 = vmax.f32 %v81_v41, 0.0  ;;  %v84_v41 = vld [vmem:[%s9061_s0 + $0x158] sm:$0xff] }
 0x13a   :  { %v3119_v42 = vadd.f32 %v3118_v39, %v3049_v27  ;;  %6581 = vmatpush1.xpose.msra.mxu0 %v480_v35  ;;  %6616 = vmatprep.mubr.f32.mxu0 %v1206_v34  ;;  %v492_v35 = vld [vmem:[#allocation2 + $0xaf8] sm:$0x3] }
 0x13b   :  { %v3188_v45 = vpop.f32.mrf.mxu1  ;;  %6547 = vmatmul.mubr.f32.vlgmr.msra.gmra.mxu1 %v1188_v7  ;;  %v3120_v46 = vpop.f32.mrf.mxu0  ;;  %6582 = vmatprep.subr.mxu0 %v282_v36  ;;  %v1239_v7 = vrot.slane %v1225_v59, %v8803_v11  ;;  %v1240_v13 = vcombine.high %v1232_v1, %v1232_v1  ;;  %v294_v36 = vld [vmem:[#allocation2 + $0x4c8] sm:$0xff]  ;;  %v1276_v59 = vcombine.high %v131_v51, %v131_v51 }
 0x13c   :  { %v3189_v48 = vadd.f32 %v3188_v45, %v3119_v42  ;;  %6651 = vmatpush1.xpose.msra.mxu1 %v482_v40  ;;  %6686 = vmatprep.mubr.f32.mxu1 %v1207_v37  ;;  %v494_v40 = vld [vmem:[#allocation2 + $0xb08] sm:$0x3] }
 0x13d   :  { %v3190_v52 = vpop.f32.mrf.mxu1  ;;  %6652 = vmatprep.subr.mxu1 %v284_v43  ;;  %v1241_v16 = vcombine.high %v1239_v7, %v1239_v7  ;;  %v296_v43 = vld [vmem:[#allocation2 + $0x4d8] sm:$0xff] }
 0x13e   :  { %6583 = vmatpush1.xpose.msra.mxu0 %v281_v47  ;;  %v293_v47 = vld [vmem:[#allocation2 + $0x4c0] sm:$0xff] }
 0x13f   :  { %6720 = vmatprep.subr.mxu0 %v485_v49  ;;  %v497_v49 = vld [vmem:[#allocation2 + $0xb20] sm:$0x3] }
 0x140   :  { %6653 = vmatpush1.xpose.msra.mxu1 %v283_v53  ;;  %v295_v53 = vld [vmem:[#allocation2 + $0x4d0] sm:$0xff] }
 0x141   :  { %v3258_v60 = vpop.f32.mrf.mxu0  ;;  %6617 = vmatmul.mubr.f32.vlgmr.msra.gmra.mxu0 %v1198_v23  ;;  %6790 = vmatprep.subr.mxu1 %v487_v54  ;;  %v1249_v23 = vrot.slane %v129_v8, %v8803_v11  ;;  %v499_v54 = vld [vmem:[#allocation2 + $0xb30] sm:$0x3]  ;;  %v132_v8 = vmax.f32 %v82_v62, 0.0  ;;  %v85_v62 = vld [vmem:[%s9061_s0 + $0x160] sm:$0xff] }
 0x142   :  { %v3259_v63 = vadd.f32 %v3258_v60, %v3189_v48  ;;  %6721 = vmatpush1.xpose.msra.mxu0 %v484_v56  ;;  %6756 = vmatprep.mubr.f32.mxu0 %v1223_v55  ;;  %v496_v56 = vld [vmem:[#allocation2 + $0xb18] sm:$0x3] }
 0x143   :  { %v3328_v2 = vpop.f32.mrf.mxu1  ;;  %6687 = vmatmul.mubr.f32.vlgmr.msra.gmra.mxu1 %v1205_v29  ;;  %v3260_v3 = vpop.f32.mrf.mxu0  ;;  %6722 = vmatprep.subr.mxu0 %v286_v57  ;;  %v1256_v29 = vrot.slane %v1242_v17, %v8803_v11  ;;  %v1257_v34 = vcombine.high %v1249_v23, %v1249_v23  ;;  %v298_v57 = vld [vmem:[#allocation2 + $0x4e8] sm:$0xff]  ;;  %v1293_v17 = vcombine.high %v132_v8, %v132_v8 }
 0x144   :  { %v3329_v5 = vadd.f32 %v3328_v2, %v3259_v63  ;;  %6791 = vmatpush1.xpose.msra.mxu1 %v486_v61  ;;  %6826 = vmatprep.mubr.f32.mxu1 %v1224_v58  ;;  %v498_v61 = vld [vmem:[#allocation2 + $0xb28] sm:$0x3] }
 0x145   :  { %v3330_v9 = vpop.f32.mrf.mxu1  ;;  %6792 = vmatprep.subr.mxu1 %v288_v0  ;;  %v1258_v37 = vcombine.high %v1256_v29, %v1256_v29  ;;  %v300_v0 = vld [vmem:[#allocation2 + $0x4f8] sm:$0xff] }
 0x146   :  { %6723 = vmatpush1.xpose.msra.mxu0 %v285_v4  ;;  %v297_v4 = vld [vmem:[#allocation2 + $0x4e0] sm:$0xff] }
 0x147   :  { %6860 = vmatprep.subr.mxu0 %v489_v6  ;;  %v501_v6 = vld [vmem:[#allocation2 + $0xb40] sm:$0x3] }
 0x148   :  { %6793 = vmatpush1.xpose.msra.mxu1 %v287_v10  ;;  %v299_v10 = vld [vmem:[#allocation2 + $0x4f0] sm:$0xff] }
 0x149   :  { %v3398_v18 = vpop.f32.mrf.mxu0  ;;  %6757 = vmatmul.mubr.f32.vlgmr.msra.gmra.mxu0 %v1215_v44  ;;  %6930 = vmatprep.subr.mxu1 %v491_v12  ;;  %v1266_v44 = vrot.slane %v130_v30, %v8803_v11  ;;  %v503_v12 = vld [vmem:[#allocation2 + $0xb50] sm:$0x3]  ;;  %v133_v30 = vmax.f32 %v83_v20, 0.0  ;;  %v86_v20 = vld [vmem:[%s9061_s0 + $0x168] sm:$0xff] }
 0x14a   :  { %v3399_v21 = vadd.f32 %v3398_v18, %v3329_v5  ;;  %6861 = vmatpush1.xpose.msra.mxu0 %v488_v14  ;;  %6896 = vmatprep.mubr.f32.mxu0 %v1240_v13  ;;  %v500_v14 = vld [vmem:[#allocation2 + $0xb38] sm:$0x3] }
 0x14b   :  { %v3468_v24 = vpop.f32.mrf.mxu1  ;;  %6827 = vmatmul.mubr.f32.vlgmr.msra.gmra.mxu1 %v1222_v50  ;;  %v3400_v25 = vpop.f32.mrf.mxu0  ;;  %6862 = vmatprep.subr.mxu0 %v290_v15  ;;  %v1273_v50 = vrot.slane %v1259_v38, %v8803_v11  ;;  %v1274_v55 = vcombine.high %v1266_v44, %v1266_v44  ;;  %v302_v15 = vld [vmem:[#allocation2 + $0x508] sm:$0xff]  ;;  %v1310_v38 = vcombine.high %v133_v30, %v133_v30 }
 0x14c   :  { %v3469_v27 = vadd.f32 %v3468_v24, %v3399_v21  ;;  %6931 = vmatpush1.xpose.msra.mxu1 %v490_v19  ;;  %6966 = vmatprep.mubr.f32.mxu1 %v1241_v16  ;;  %v502_v19 = vld [vmem:[#allocation2 + $0xb48] sm:$0x3] }
 0x14d   :  { %v3470_v31 = vpop.f32.mrf.mxu1  ;;  %6932 = vmatprep.subr.mxu1 %v292_v22  ;;  %v1275_v58 = vcombine.high %v1273_v50, %v1273_v50  ;;  %v304_v22 = vld [vmem:[#allocation2 + $0x518] sm:$0xff] }
 0x14e   :  { %6863 = vmatpush1.xpose.msra.mxu0 %v289_v26  ;;  %v301_v26 = vld [vmem:[#allocation2 + $0x500] sm:$0xff] }
 0x14f   :  { %7000 = vmatprep.subr.mxu0 %v493_v28  ;;  %v505_v28 = vld [vmem:[#allocation2 + $0xb60] sm:$0x3] }
 0x150   :  { %6933 = vmatpush1.xpose.msra.mxu1 %v291_v32  ;;  %v303_v32 = vld [vmem:[#allocation2 + $0x510] sm:$0xff] }
 0x151   :  { %v3538_v39 = vpop.f32.mrf.mxu0  ;;  %6897 = vmatmul.mubr.f32.vlgmr.msra.gmra.mxu0 %v1232_v1  ;;  %7070 = vmatprep.subr.mxu1 %v495_v33  ;;  %v1283_v1 = vrot.slane %v131_v51, %v8803_v11  ;;  %v507_v33 = vld [vmem:[#allocation2 + $0xb70] sm:$0x3]  ;;  %v134_v51 = vmax.f32 %v84_v41, 0.0 }
 0x152   :  { %v3539_v42 = vadd.f32 %v3538_v39, %v3469_v27  ;;  %7001 = vmatpush1.xpose.msra.mxu0 %v492_v35  ;;  %7036 = vmatprep.mubr.f32.mxu0 %v1257_v34  ;;  %v504_v35 = vld [vmem:[#allocation2 + $0xb58] sm:$0x3]  ;;  %v87_v41 = vld [vmem:[%s9061_s0 + $0x170] sm:$0xff] }
 0x153   :  { %v3608_v45 = vpop.f32.mrf.mxu1  ;;  %6967 = vmatmul.mubr.f32.vlgmr.msra.gmra.mxu1 %v1239_v7  ;;  %v3540_v46 = vpop.f32.mrf.mxu0  ;;  %7002 = vmatprep.subr.mxu0 %v294_v36  ;;  %v1290_v7 = vrot.slane %v1276_v59, %v8803_v11  ;;  %v1291_v13 = vcombine.high %v1283_v1, %v1283_v1  ;;  %v306_v36 = vld [vmem:[#allocation2 + $0x528] sm:$0xff]  ;;  %v1327_v59 = vcombine.high %v134_v51, %v134_v51 }
 0x154   :  { %v3609_v48 = vadd.f32 %v3608_v45, %v3539_v42  ;;  %7071 = vmatpush1.xpose.msra.mxu1 %v494_v40  ;;  %7106 = vmatprep.mubr.f32.mxu1 %v1258_v37  ;;  %v506_v40 = vld [vmem:[#allocation2 + $0xb68] sm:$0x3] }
 0x155   :  { %v3610_v52 = vpop.f32.mrf.mxu1  ;;  %7072 = vmatprep.subr.mxu1 %v296_v43  ;;  %v1292_v16 = vcombine.high %v1290_v7, %v1290_v7  ;;  %v308_v43 = vld [vmem:[#allocation2 + $0x538] sm:$0xff] }
 0x156   :  { %7003 = vmatpush1.xpose.msra.mxu0 %v293_v47  ;;  %v305_v47 = vld [vmem:[#allocation2 + $0x520] sm:$0xff] }
 0x157   :  { %7140 = vmatprep.subr.mxu0 %v497_v49  ;;  %v509_v49 = vld [vmem:[#allocation2 + $0xb80] sm:$0x3] }
 0x158   :  { %7073 = vmatpush1.xpose.msra.mxu1 %v295_v53  ;;  %v307_v53 = vld [vmem:[#allocation2 + $0x530] sm:$0xff] }
 0x159   :  { %v3678_v60 = vpop.f32.mrf.mxu0  ;;  %7037 = vmatmul.mubr.f32.vlgmr.msra.gmra.mxu0 %v1249_v23  ;;  %7210 = vmatprep.subr.mxu1 %v499_v54  ;;  %v1300_v23 = vrot.slane %v132_v8, %v8803_v11  ;;  %v511_v54 = vld [vmem:[#allocation2 + $0xb90] sm:$0x3]  ;;  %v135_v8 = vmax.f32 %v85_v62, 0.0  ;;  %v88_v62 = vld [vmem:[%s9061_s0 + $0x178] sm:$0xff] }
 0x15a   :  { %v3679_v63 = vadd.f32 %v3678_v60, %v3609_v48  ;;  %7141 = vmatpush1.xpose.msra.mxu0 %v496_v56  ;;  %7176 = vmatprep.mubr.f32.mxu0 %v1274_v55  ;;  %v508_v56 = vld [vmem:[#allocation2 + $0xb78] sm:$0x3] }
 0x15b   :  { %v3748_v2 = vpop.f32.mrf.mxu1  ;;  %7107 = vmatmul.mubr.f32.vlgmr.msra.gmra.mxu1 %v1256_v29  ;;  %v3680_v3 = vpop.f32.mrf.mxu0  ;;  %7142 = vmatprep.subr.mxu0 %v298_v57  ;;  %v1307_v29 = vrot.slane %v1293_v17, %v8803_v11  ;;  %v1308_v34 = vcombine.high %v1300_v23, %v1300_v23  ;;  %v310_v57 = vld [vmem:[#allocation2 + $0x548] sm:$0xff]  ;;  %v1344_v17 = vcombine.high %v135_v8, %v135_v8 }
 0x15c   :  { %v3749_v5 = vadd.f32 %v3748_v2, %v3679_v63  ;;  %7211 = vmatpush1.xpose.msra.mxu1 %v498_v61  ;;  %7246 = vmatprep.mubr.f32.mxu1 %v1275_v58  ;;  %v510_v61 = vld [vmem:[#allocation2 + $0xb88] sm:$0x3] }
 0x15d   :  { %v3750_v9 = vpop.f32.mrf.mxu1  ;;  %7212 = vmatprep.subr.mxu1 %v300_v0  ;;  %v1309_v37 = vcombine.high %v1307_v29, %v1307_v29  ;;  %v312_v0 = vld [vmem:[#allocation2 + $0x558] sm:$0xff] }
 0x15e   :  { %7143 = vmatpush1.xpose.msra.mxu0 %v297_v4  ;;  %v309_v4 = vld [vmem:[#allocation2 + $0x540] sm:$0xff] }
 0x15f   :  { %7280 = vmatprep.subr.mxu0 %v501_v6  ;;  %v513_v6 = vld [vmem:[#allocation2 + $0xba0] sm:$0x3] }
 0x160   :  { %7213 = vmatpush1.xpose.msra.mxu1 %v299_v10  ;;  %v311_v10 = vld [vmem:[#allocation2 + $0x550] sm:$0xff] }
 0x161   :  { %v3818_v18 = vpop.f32.mrf.mxu0  ;;  %7177 = vmatmul.mubr.f32.vlgmr.msra.gmra.mxu0 %v1266_v44  ;;  %7350 = vmatprep.subr.mxu1 %v503_v12  ;;  %v1317_v44 = vrot.slane %v133_v30, %v8803_v11  ;;  %v515_v12 = vld [vmem:[#allocation2 + $0xbb0] sm:$0x3]  ;;  %v136_v30 = vmax.f32 %v86_v20, 0.0  ;;  %v89_v20 = vld [vmem:[%s9061_s0 + $0x180] sm:$0xff] }
 0x162   :  { %v3819_v21 = vadd.f32 %v3818_v18, %v3749_v5  ;;  %7281 = vmatpush1.xpose.msra.mxu0 %v500_v14  ;;  %7316 = vmatprep.mubr.f32.mxu0 %v1291_v13  ;;  %v512_v14 = vld [vmem:[#allocation2 + $0xb98] sm:$0x3] }
 0x163   :  { %v3888_v24 = vpop.f32.mrf.mxu1  ;;  %7247 = vmatmul.mubr.f32.vlgmr.msra.gmra.mxu1 %v1273_v50  ;;  %v3820_v25 = vpop.f32.mrf.mxu0  ;;  %7282 = vmatprep.subr.mxu0 %v302_v15  ;;  %v1324_v50 = vrot.slane %v1310_v38, %v8803_v11  ;;  %v1325_v55 = vcombine.high %v1317_v44, %v1317_v44  ;;  %v314_v15 = vld [vmem:[#allocation2 + $0x568] sm:$0xff]  ;;  %v1361_v38 = vcombine.high %v136_v30, %v136_v30 }
 0x164   :  { %v3889_v27 = vadd.f32 %v3888_v24, %v3819_v21  ;;  %7351 = vmatpush1.xpose.msra.mxu1 %v502_v19  ;;  %7386 = vmatprep.mubr.f32.mxu1 %v1292_v16  ;;  %v514_v19 = vld [vmem:[#allocation2 + $0xba8] sm:$0x3] }
 0x165   :  { %v3890_v31 = vpop.f32.mrf.mxu1  ;;  %7352 = vmatprep.subr.mxu1 %v304_v22  ;;  %v1326_v58 = vcombine.high %v1324_v50, %v1324_v50  ;;  %v316_v22 = vld [vmem:[#allocation2 + $0x578] sm:$0xff] }
 0x166   :  { %7283 = vmatpush1.xpose.msra.mxu0 %v301_v26  ;;  %v313_v26 = vld [vmem:[#allocation2 + $0x560] sm:$0xff] }
 0x167   :  { %7420 = vmatprep.subr.mxu0 %v505_v28  ;;  %v517_v28 = vld [vmem:[#allocation2 + $0xbc0] sm:$0x3] }
 0x168   :  { %7353 = vmatpush1.xpose.msra.mxu1 %v303_v32  ;;  %v315_v32 = vld [vmem:[#allocation2 + $0x570] sm:$0xff] }
 0x169   :  { %v3958_v39 = vpop.f32.mrf.mxu0  ;;  %7317 = vmatmul.mubr.f32.vlgmr.msra.gmra.mxu0 %v1283_v1  ;;  %7490 = vmatprep.subr.mxu1 %v507_v33  ;;  %v1334_v1 = vrot.slane %v134_v51, %v8803_v11  ;;  %v519_v33 = vld [vmem:[#allocation2 + $0xbd0] sm:$0x3]  ;;  %v137_v51 = vmax.f32 %v87_v41, 0.0 }
 0x16a   :  { %v3959_v42 = vadd.f32 %v3958_v39, %v3889_v27  ;;  %7421 = vmatpush1.xpose.msra.mxu0 %v504_v35  ;;  %7456 = vmatprep.mubr.f32.mxu0 %v1308_v34  ;;  %v516_v35 = vld [vmem:[#allocation2 + $0xbb8] sm:$0x3] }
 0x16b   :  { %v4028_v45 = vpop.f32.mrf.mxu1  ;;  %7387 = vmatmul.mubr.f32.vlgmr.msra.gmra.mxu1 %v1290_v7  ;;  %v3960_v46 = vpop.f32.mrf.mxu0  ;;  %7422 = vmatprep.subr.mxu0 %v306_v36  ;;  %v1341_v7 = vrot.slane %v1327_v59, %v8803_v11  ;;  %v1342_v13 = vcombine.high %v1334_v1, %v1334_v1  ;;  %v318_v36 = vld [vmem:[#allocation2 + $0x588] sm:$0xff]  ;;  %v1378_v59 = vcombine.high %v137_v51, %v137_v51 }
 0x16c   :  { %v4029_v48 = vadd.f32 %v4028_v45, %v3959_v42  ;;  %7491 = vmatpush1.xpose.msra.mxu1 %v506_v40  ;;  %7526 = vmatprep.mubr.f32.mxu1 %v1309_v37  ;;  %v518_v40 = vld [vmem:[#allocation2 + $0xbc8] sm:$0x3] }
 0x16d   :  { %v4030_v52 = vpop.f32.mrf.mxu1  ;;  %7492 = vmatprep.subr.mxu1 %v308_v43  ;;  %v1343_v16 = vcombine.high %v1341_v7, %v1341_v7  ;;  %v320_v43 = vld [vmem:[#allocation2 + $0x598] sm:$0xff] }
 0x16e   :  { %7423 = vmatpush1.xpose.msra.mxu0 %v305_v47  ;;  %v317_v47 = vld [vmem:[#allocation2 + $0x580] sm:$0xff] }
 0x16f   :  { %7560 = vmatprep.subr.mxu0 %v509_v49  ;;  %v521_v49 = vld [vmem:[#allocation2 + $0xbe0] sm:$0x3] }
 0x170   :  { %7493 = vmatpush1.xpose.msra.mxu1 %v307_v53  ;;  %v319_v53 = vld [vmem:[#allocation2 + $0x590] sm:$0xff] }
 0x171   :  { %v4098_v60 = vpop.f32.mrf.mxu0  ;;  %7457 = vmatmul.mubr.f32.vlgmr.msra.gmra.mxu0 %v1300_v23  ;;  %7630 = vmatprep.subr.mxu1 %v511_v54  ;;  %v1351_v23 = vrot.slane %v135_v8, %v8803_v11  ;;  %v523_v54 = vld [vmem:[#allocation2 + $0xbf0] sm:$0x3]  ;;  %v138_v8 = vmax.f32 %v88_v62, 0.0  ;;  %v336_v62 = vld [vmem:[#allocation2 + $0x618] sm:$0xff] }
 0x172   :  { %v4099_v63 = vadd.f32 %v4098_v60, %v4029_v48  ;;  %7561 = vmatpush1.xpose.msra.mxu0 %v508_v56  ;;  %7596 = vmatprep.mubr.f32.mxu0 %v1325_v55  ;;  %v520_v56 = vld [vmem:[#allocation2 + $0xbd8] sm:$0x3] }
 0x173   :  { %v4168_v2 = vpop.f32.mrf.mxu1  ;;  %7527 = vmatmul.mubr.f32.vlgmr.msra.gmra.mxu1 %v1307_v29  ;;  %v4100_v3 = vpop.f32.mrf.mxu0  ;;  %7562 = vmatprep.subr.mxu0 %v310_v57  ;;  %v1358_v29 = vrot.slane %v1344_v17, %v8803_v11  ;;  %v1359_v34 = vcombine.high %v1351_v23, %v1351_v23  ;;  %v322_v57 = vld [vmem:[#allocation2 + $0x5a8] sm:$0xff]  ;;  %v1395_v17 = vcombine.high %v138_v8, %v138_v8 }
 0x174   :  { %v4169_v5 = vadd.f32 %v4168_v2, %v4099_v63  ;;  %7631 = vmatpush1.xpose.msra.mxu1 %v510_v61  ;;  %7666 = vmatprep.mubr.f32.mxu1 %v1326_v58  ;;  %v522_v61 = vld [vmem:[#allocation2 + $0xbe8] sm:$0x3] }
 0x175   :  { %v4170_v9 = vpop.f32.mrf.mxu1  ;;  %7632 = vmatprep.subr.mxu1 %v312_v0  ;;  %v1360_v37 = vcombine.high %v1358_v29, %v1358_v29  ;;  %v324_v0 = vld [vmem:[#allocation2 + $0x5b8] sm:$0xff] }
 0x176   :  { %7563 = vmatpush1.xpose.msra.mxu0 %v309_v4  ;;  %v321_v4 = vld [vmem:[#allocation2 + $0x5a0] sm:$0xff] }
 0x177   :  { %7700 = vmatprep.subr.mxu0 %v513_v6  ;;  %v525_v6 = vld [vmem:[#allocation2 + $0xc00] sm:$0x3] }
 0x178   :  { %7633 = vmatpush1.xpose.msra.mxu1 %v311_v10  ;;  %v323_v10 = vld [vmem:[#allocation2 + $0x5b0] sm:$0xff] }
 0x179   :  { %v4238_v18 = vpop.f32.mrf.mxu0  ;;  %7597 = vmatmul.mubr.f32.vlgmr.msra.gmra.mxu0 %v1317_v44  ;;  %7770 = vmatprep.subr.mxu1 %v515_v12  ;;  %v1368_v44 = vrot.slane %v136_v30, %v8803_v11  ;;  %v527_v12 = vld [vmem:[#allocation2 + $0xc10] sm:$0x3]  ;;  %v139_v30 = vmax.f32 %v89_v20, 0.0 }
 0x17a   :  { %v4239_v21 = vadd.f32 %v4238_v18, %v4169_v5  ;;  %7701 = vmatpush1.xpose.msra.mxu0 %v512_v14  ;;  %7736 = vmatprep.mubr.f32.mxu0 %v1342_v13  ;;  %v524_v14 = vld [vmem:[#allocation2 + $0xbf8] sm:$0x3] }
 0x17b   :  { %v4308_v24 = vpop.f32.mrf.mxu1  ;;  %7667 = vmatmul.mubr.f32.vlgmr.msra.gmra.mxu1 %v1324_v50  ;;  %v4240_v25 = vpop.f32.mrf.mxu0  ;;  %7702 = vmatprep.subr.mxu0 %v314_v15  ;;  %v1375_v50 = vrot.slane %v1361_v38, %v8803_v11  ;;  %v1376_v55 = vcombine.high %v1368_v44, %v1368_v44  ;;  %v326_v15 = vld [vmem:[#allocation2 + $0x5c8] sm:$0xff]  ;;  %v1412_v38 = vcombine.high %v139_v30, %v139_v30 }
 0x17c   :  { %v4309_v27 = vadd.f32 %v4308_v24, %v4239_v21  ;;  %7771 = vmatpush1.xpose.msra.mxu1 %v514_v19  ;;  %7806 = vmatprep.mubr.f32.mxu1 %v1343_v16  ;;  %v526_v19 = vld [vmem:[#allocation2 + $0xc08] sm:$0x3] }
 0x17d   :  { %v4310_v31 = vpop.f32.mrf.mxu1  ;;  %7772 = vmatprep.subr.mxu1 %v316_v22  ;;  %v1377_v58 = vcombine.high %v1375_v50, %v1375_v50  ;;  %v328_v22 = vld [vmem:[#allocation2 + $0x5d8] sm:$0xff] }
 0x17e   :  { %7703 = vmatpush1.xpose.msra.mxu0 %v313_v26  ;;  %v325_v26 = vld [vmem:[#allocation2 + $0x5c0] sm:$0xff] }
 0x17f   :  { %7840 = vmatprep.subr.mxu0 %v517_v28  ;;  %v529_v28 = vld [vmem:[#allocation2 + $0xc20] sm:$0x3] }
 0x180   :  { %7773 = vmatpush1.xpose.msra.mxu1 %v315_v32  ;;  %v327_v32 = vld [vmem:[#allocation2 + $0x5d0] sm:$0xff] }
 0x181   :  { %v4378_v39 = vpop.f32.mrf.mxu0  ;;  %7737 = vmatmul.mubr.f32.vlgmr.msra.gmra.mxu0 %v1334_v1  ;;  %7910 = vmatprep.subr.mxu1 %v519_v33  ;;  %v1385_v1 = vrot.slane %v137_v51, %v8803_v11  ;;  %v531_v33 = vld [vmem:[#allocation2 + $0xc30] sm:$0x3] }
 0x182   :  { %v4379_v42 = vadd.f32 %v4378_v39, %v4309_v27  ;;  %7841 = vmatpush1.xpose.msra.mxu0 %v516_v35  ;;  %7876 = vmatprep.mubr.f32.mxu0 %v1359_v34  ;;  %v528_v35 = vld [vmem:[#allocation2 + $0xc18] sm:$0x3] }
 0x183   :  { %v4448_v45 = vpop.f32.mrf.mxu1  ;;  %7807 = vmatmul.mubr.f32.vlgmr.msra.gmra.mxu1 %v1341_v7  ;;  %v4380_v46 = vpop.f32.mrf.mxu0  ;;  %7842 = vmatprep.subr.mxu0 %v318_v36  ;;  %v1392_v7 = vrot.slane %v1378_v59, %v8803_v11  ;;  %v1393_v13 = vcombine.high %v1385_v1, %v1385_v1  ;;  %v330_v36 = vld [vmem:[#allocation2 + $0x5e8] sm:$0xff] }
 0x184   :  { %v4449_v48 = vadd.f32 %v4448_v45, %v4379_v42  ;;  %7911 = vmatpush1.xpose.msra.mxu1 %v518_v40  ;;  %7946 = vmatprep.mubr.f32.mxu1 %v1360_v37  ;;  %v530_v40 = vld [vmem:[#allocation2 + $0xc28] sm:$0x3]  ;;  %v332_v42 = vld [vmem:[#allocation2 + $0x5f8] sm:$0xff]  ;;  %v329_v46 = vld [vmem:[#allocation2 + $0x5e0] sm:$0xff] }
 0x185   :  { %v4450_v52 = vpop.f32.mrf.mxu1  ;;  %7912 = vmatprep.subr.mxu1 %v320_v43  ;;  %v1394_v16 = vcombine.high %v1392_v7, %v1392_v7  ;;  %v1419_v43 = vrot.slane %v139_v30, %v8803_v11 }
 0x186   :  { %7843 = vmatpush1.xpose.msra.mxu0 %v317_v47  ;;  %v90_v47 = vld [vmem:[%s9061_s0 + $0x188] sm:$0x3f]  ;;  %v331_v52 = vld [vmem:[#allocation2 + $0x5f0] sm:$0xff]  ;;  %s8776_s0 = smov [#allocation7]  }
 0x187   :  { %7980 = vmatprep.subr.mxu0 %v521_v49  ;;  %v533_v49 = vld [vmem:[#allocation2 + $0xc40] sm:$0x3]  ;;  %s8666_s9 = sshll.u32 %s8776_s0, 4  ;;  %s8667_s9 = int_to_ptr.vmem [resolvable:$true] %s8666_s9 }
 0x188   :  { %7913 = vmatpush1.xpose.msra.mxu1 %v319_v53  ;;  %v535_v53 = vld [vmem:[#allocation2 + $0xc50] sm:$0x3]  ;;  %s8743_s10 = scalar_lea.vmem %s8667_s9, 32  ;;  %p8748_p11 = scmp.lt.s32.totalorder %s8667_s9, %s8667_s9 }
 0x189   :  { %v4518_v60 = vpop.f32.mrf.mxu0  ;;  %7877 = vmatmul.mubr.f32.vlgmr.msra.gmra.mxu0 %v1351_v23  ;;  %8050 = vmatprep.subr.mxu1 %v523_v54  ;;  %v1402_v23 = vrot.slane %v138_v8, %v8803_v11  ;;  %v1427_v54 = vcombine.high %v1419_v43, %v1419_v43  ;;  %v536_v8 = vld [vmem:[#allocation2 + $0xc58] sm:$0x3]  ;;  %p8744_p10 = scmp.ne.s32.totalorder %s8667_s9, %s8743_s10  ;;  %p8749_p12 = scmp.lt.s32.totalorder %s8743_s10, %s8743_s10 }
 0x18a   :  { %v4519_v63 = vadd.f32 %v4518_v60, %v4449_v48  ;;  %7981 = vmatpush1.xpose.msra.mxu0 %v520_v56  ;;  %8016 = vmatprep.mubr.f32.mxu0 %v1376_v55  ;;  %v140_v55 = vmax.f32 %v90_v47, 0.0  ;;  %v532_v56 = vld [vmem:[#allocation2 + $0xc38] sm:$0x3]  ;;  %v534_v60 = vld [vmem:[#allocation2 + $0xc48] sm:$0x3] }
 0x18b   :  { %v4588_v2 = vpop.f32.mrf.mxu1  ;;  %7947 = vmatmul.mubr.f32.vlgmr.msra.gmra.mxu1 %v1358_v29  ;;  %v4520_v3 = vpop.f32.mrf.mxu0  ;;  %7982 = vmatprep.subr.mxu0 %v322_v57  ;;  %v1409_v29 = vrot.slane %v1395_v17, %v8803_v11  ;;  %v1410_v34 = vcombine.high %v1402_v23, %v1402_v23  ;;  %v334_v57 = vld [vmem:[#allocation2 + $0x608] sm:$0xff]  ;;  %v337_v17 = vld [vmem:[#allocation2 + $0x620] sm:$0xff]  ;;  %p8750_p13 = por %p8749_p12, %p8748_p11 }
 0x18c   :  { %v4589_v5 = vadd.f32 %v4588_v2, %v4519_v63  ;;  %8051 = vmatpush1.xpose.msra.mxu1 %v522_v61  ;;  %8086 = vmatprep.mubr.f32.mxu1 %v1377_v58  ;;  %v1436_v63 = vrot.slane %v140_v55, %v8803_v11  ;;  %v333_v2 = vld [vmem:[#allocation2 + $0x600] sm:$0xff] }
 0x18d   :  { %v4590_v9 = vpop.f32.mrf.mxu1  ;;  %8052 = vmatprep.subr.mxu1 %v324_v0  ;;  %v1411_v37 = vcombine.high %v1409_v29, %v1409_v29  ;;  %p8751_p0 = pnand %p8750_p13, %p8744_p10 }
 0x18e   :  { %7983 = vmatpush1.xpose.msra.mxu0 %v321_v4  ;;  %v537_v4 = vld [vmem:[#allocation2 + $0xc60] sm:$0x3]  ;;  %v338_v9 = vld [vmem:[#allocation2 + $0x628] sm:$0xff] }
 0x18f   :  { %8120 = vmatprep.subr.mxu0 %v525_v6  ;;  %v335_v6 = vld [vmem:[#allocation2 + $0x610] sm:$0xff] }
 0x190   :  { %8053 = vmatpush1.xpose.msra.mxu1 %v323_v10 }
 0x191   :  { %v4658_v18 = vpop.f32.mrf.mxu0  ;;  %8017 = vmatmul.mubr.f32.vlgmr.msra.gmra.mxu0 %v1368_v44  ;;  %8190 = vmatprep.subr.mxu1 %v527_v12  ;;  %v8774_v12 = vmov 0.0  }
 0x192   :  { %v4659_v21 = vadd.f32 %v4658_v18, %v4589_v5  ;;  %8121 = vmatpush1.xpose.msra.mxu0 %v524_v14  ;;  %8156 = vmatprep.mubr.f32.mxu0 %v1393_v13  ;;  %v538_v13 = vld [vmem:[#allocation2 + $0xc68] sm:$0x3]  ;;  %v1429_v18 = vcombine.high %v140_v55, %v140_v55 }
 0x193   :  { %v4728_v24 = vpop.f32.mrf.mxu1  ;;  %8087 = vmatmul.mubr.f32.vlgmr.msra.gmra.mxu1 %v1375_v50  ;;  %v4660_v25 = vpop.f32.mrf.mxu0  ;;  %8122 = vmatprep.subr.mxu0 %v326_v15  ;;  %v1426_v50 = vrot.slane %v1412_v38, %v8803_v11 }
 0x194   :  { %v4729_v27 = vadd.f32 %v4728_v24, %v4659_v21  ;;  %8191 = vmatpush1.xpose.msra.mxu1 %v526_v19  ;;  %8226 = vmatprep.mubr.f32.mxu1 %v1394_v16  ;;  %v339_v21 = vld [vmem:[#allocation2 + $0x630] sm:$0xff] }
 0x195   :  { %v4730_v31 = vpop.f32.mrf.mxu1  ;;  %8192 = vmatprep.subr.mxu1 %v328_v22  ;;  %v1428_v58 = vcombine.high %v1426_v50, %v1426_v50  ;;  %v1443_v22 = vrot.slane %v1429_v18, %v8803_v11 }
 0x196   :  { %8123 = vmatpush1.xpose.msra.mxu0 %v325_v26 }
 0x197   :  { %8260 = vmatprep.subr.mxu0 %v529_v28 }
 0x198   :  { %8193 = vmatpush1.xpose.msra.mxu1 %v327_v32 }
 0x199   :  { %v4798_v39 = vpop.f32.mrf.mxu0  ;;  %8157 = vmatmul.mubr.f32.vlgmr.msra.gmra.mxu0 %v1385_v1  ;;  %8330 = vmatprep.subr.mxu1 %v531_v33 }
 0x19a   :  { %v4799_v41 = vadd.f32 %v4798_v39, %v4729_v27  ;;  %8261 = vmatpush1.xpose.msra.mxu0 %v528_v35  ;;  %8296 = vmatprep.mubr.f32.mxu0 %v1410_v34 }
 0x19b   :  { %v4868_v44 = vpop.f32.mrf.mxu1  ;;  %8227 = vmatmul.mubr.f32.vlgmr.msra.gmra.mxu1 %v1392_v7  ;;  %v4800_v45 = vpop.f32.mrf.mxu0  ;;  %8262 = vmatprep.subr.mxu0 %v330_v36  ;;  %v1444_v7 = vcombine.high %v1436_v63, %v1436_v63 }
 0x19c   :  { %v4869_v48 = vadd.f32 %v4868_v44, %v4799_v41  ;;  %8331 = vmatpush1.xpose.msra.mxu1 %v530_v40  ;;  %8366 = vmatprep.mubr.f32.mxu1 %v1411_v37 }
 0x19d   :  { %v4870_v51 = vpop.f32.mrf.mxu1  ;;  %8332 = vmatprep.subr.mxu1 %v332_v42 }
 0x19e   :  { %8263 = vmatpush1.xpose.msra.mxu0 %v329_v46 }
 0x19f   :  { %8400 = vmatprep.subr.mxu0 %v533_v49 }
 0x1a0   :  { %8333 = vmatpush1.xpose.msra.mxu1 %v331_v52 }
 0x1a1   :  { %v4938_v59 = vpop.f32.mrf.mxu0  ;;  %8297 = vmatmul.mubr.f32.vlgmr.msra.gmra.mxu0 %v1402_v23  ;;  %8470 = vmatprep.subr.mxu1 %v535_v53 }
 0x1a2   :  { %v4939_v61 = vadd.f32 %v4938_v59, %v4869_v48  ;;  %8401 = vmatpush1.xpose.msra.mxu0 %v532_v56  ;;  %8436 = vmatprep.mubr.f32.mxu0 %v1427_v54 }
 0x1a3   :  { %v5008_v0 = vpop.f32.mrf.mxu1  ;;  %8367 = vmatmul.mubr.f32.vlgmr.msra.gmra.mxu1 %v1409_v29  ;;  %v4940_v1 = vpop.f32.mrf.mxu0  ;;  %8402 = vmatprep.subr.mxu0 %v334_v57 }
 0x1a4   :  { %v5009_v3 = vadd.f32 %v5008_v0, %v4939_v61  ;;  %8471 = vmatpush1.xpose.msra.mxu1 %v534_v60  ;;  %8506 = vmatprep.mubr.f32.mxu1 %v1428_v58 }
 0x1a5   :  { %v5010_v5 = vpop.f32.mrf.mxu1  ;;  %8472 = vmatprep.subr.mxu1 %v336_v62 }
 0x1a6   :  { %8403 = vmatpush1.xpose.msra.mxu0 %v333_v2 }
 0x1a7   :  { %8540 = vmatprep.subr.mxu0 %v537_v4 }
 0x1a8   :  { %8473 = vmatpush1.xpose.msra.mxu1 %v335_v6 }
 0x1a9   :  { %v5078_v10 = vpop.f32.mrf.mxu0  ;;  %8437 = vmatmul.mubr.f32.vlgmr.msra.gmra.mxu0 %v1419_v43  ;;  %8684 = vmatprep.subr.mxu1 %v8774_v12 }
 0x1aa   :  { %v5079_v14 = vadd.f32 %v5078_v10, %v5009_v3  ;;  %8541 = vmatpush1.xpose.msra.mxu0 %v536_v8  ;;  %8576 = vmatprep.mubr.f32.mxu0 %v1444_v7 }
 0x1ab   :  { %v5148_v15 = vpop.f32.mrf.mxu1  ;;  %8507 = vmatmul.mubr.f32.vlgmr.msra.gmra.mxu1 %v1426_v50  ;;  %v5080_v16 = vpop.f32.mrf.mxu0  ;;  %8542 = vmatprep.subr.mxu0 %v338_v9 }
 0x1ac   :  { %v5149_v19 = vadd.f32 %v5148_v15, %v5079_v14  ;;  %8685 = vmatpush3.xpose.msk.msra.mxu1 %vm1643_vm0, %v538_v13  ;;  %8688 = vmatprep.mubr.msk.f32.mxu1 %vm8775_vm1, %v8774_v12 }
 0x1ad   :  { %v5150_v20 = vpop.f32.mrf.mxu1  ;;  %8686 = vmatprep.subr.mxu1 %v8774_v12 }
 0x1ae   :  { %8543 = vmatpush1.xpose.msra.mxu0 %v337_v17 }
 0x1b0   :  { %8687 = vmatpush3.xpose.msk.msra.mxu1 %vm1643_vm0, %v339_v21 }
 0x1b1   :  { %v5218_v23 = vpop.f32.mrf.mxu0  ;;  %8577 = vmatmul.mubr.f32.vlgmr.msra.gmra.mxu0 %v1436_v63 }
 0x1b2   :  { %v5219_v24 = vadd.f32 %v5218_v23, %v5149_v19 }
 0x1b3   :  { %8689 = vmatmul.mubr.msk.f32.vlgmr.msra.gmra.mxu1 %vm1643_vm0, %v1443_v22  ;;  %v5288_v25 = vpop.f32.mrf.mxu1  ;;  %v5220_v26 = vpop.f32.mrf.mxu0 }
 0x1b4   :  { %v5289_v27 = vadd.f32 %v5288_v25, %v5219_v24 }
 0x1b5   :  { %v5290_v28 = vpop.f32.mrf.mxu1 }
 0x1b9   :  { %v5358_v29 = vpop.f32.mrf.mxu0 }
 0x1ba   :  { %v5359_v30 = vadd.f32 %v5358_v29, %v5289_v27 }
 0x1bb   :  { %v5428_v31 = vpop.f32.mrf.mxu1  ;;  %v5360_v32 = vpop.f32.mrf.mxu0 }
 0x1bc   :  { %v5429_v33 = vadd.f32 %v5428_v31, %v5359_v30 }
 0x1bd   :  { %v5430_v34 = vpop.f32.mrf.mxu1 }
 0x1c1   :  { %v5498_v35 = vpop.f32.mrf.mxu0 }
 0x1c2   :  { %v5499_v36 = vadd.f32 %v5498_v35, %v5429_v33 }
 0x1c3   :  { %v5568_v11 = vpop.f32.mrf.mxu1  ;;  %v5500_v37 = vpop.f32.mrf.mxu0 }
 0x1c4   :  { %v5569_v38 = vadd.f32 %v5568_v11, %v5499_v36 }
 0x1c5   :  { %v5570_v39 = vpop.f32.mrf.mxu1 }
 0x1c9   :  { %v5638_v40 = vpop.f32.mrf.mxu0 }
 0x1ca   :  { %v5639_v41 = vadd.f32 %v5638_v40, %v5569_v38 }
 0x1cb   :  { %v5708_v42 = vpop.f32.mrf.mxu1  ;;  %v5640_v43 = vpop.f32.mrf.mxu0 }
 0x1cc   :  { %v5709_v44 = vadd.f32 %v5708_v42, %v5639_v41 }
 0x1cd   :  { %v5710_v45 = vpop.f32.mrf.mxu1 }
 0x1d1   :  { %v5778_v46 = vpop.f32.mrf.mxu0 }
 0x1d2   :  { %v5779_v47 = vadd.f32 %v5778_v46, %v5709_v44 }
 0x1d3   :  { %v5848_v48 = vpop.f32.mrf.mxu1  ;;  %v5780_v49 = vpop.f32.mrf.mxu0 }
 0x1d4   :  { %v5849_v50 = vadd.f32 %v5848_v48, %v5779_v47 }
 0x1d5   :  { %v5850_v51 = vpop.f32.mrf.mxu1 }
 0x1d9   :  { %v5918_v52 = vpop.f32.mrf.mxu0 }
 0x1da   :  { %v5919_v53 = vadd.f32 %v5918_v52, %v5849_v50 }
 0x1db   :  { %v5988_v54 = vpop.f32.mrf.mxu1  ;;  %v5920_v55 = vpop.f32.mrf.mxu0 }
 0x1dc   :  { %v5989_v56 = vadd.f32 %v5988_v54, %v5919_v53 }
 0x1dd   :  { %v5990_v57 = vpop.f32.mrf.mxu1 }
 0x1e1   :  { %v6058_v58 = vpop.f32.mrf.mxu0 }
 0x1e2   :  { %v6059_v59 = vadd.f32 %v6058_v58, %v5989_v56 }
 0x1e3   :  { %v6128_v60 = vpop.f32.mrf.mxu1  ;;  %v6060_v61 = vpop.f32.mrf.mxu0 }
 0x1e4   :  { %v6129_v62 = vadd.f32 %v6128_v60, %v6059_v59 }
 0x1e5   :  { %v6130_v63 = vpop.f32.mrf.mxu1 }
 0x1e9   :  { %v6198_v0 = vpop.f32.mrf.mxu0 }
 0x1ea   :  { %v6199_v1 = vadd.f32 %v6198_v0, %v6129_v62 }
 0x1eb   :  { %v6268_v2 = vpop.f32.mrf.mxu1  ;;  %v6200_v3 = vpop.f32.mrf.mxu0 }
 0x1ec   :  { %v6269_v4 = vadd.f32 %v6268_v2, %v6199_v1 }
 0x1ed   :  { %v6270_v5 = vpop.f32.mrf.mxu1 }
 0x1f1   :  { %v6338_v6 = vpop.f32.mrf.mxu0 }
 0x1f2   :  { %v6339_v7 = vadd.f32 %v6338_v6, %v6269_v4 }
 0x1f3   :  { %v6408_v8 = vpop.f32.mrf.mxu1  ;;  %v6340_v9 = vpop.f32.mrf.mxu0 }
 0x1f4   :  { %v6409_v10 = vadd.f32 %v6408_v8, %v6339_v7 }
 0x1f5   :  { %v6410_v12 = vpop.f32.mrf.mxu1 }
 0x1f9   :  { %v6478_v13 = vpop.f32.mrf.mxu0 }
 0x1fa   :  { %v6479_v29 = vadd.f32 %v6478_v13, %v6409_v10 }
 0x1fb   :  { %v6548_v14 = vpop.f32.mrf.mxu1  ;;  %v6480_v15 = vpop.f32.mrf.mxu0 }
 0x1fc   :  { %v6549_v33 = vadd.f32 %v6548_v14, %v6479_v29 }
 0x1fd   :  { %v6550_v16 = vpop.f32.mrf.mxu1 }
 0x201   :  { %v6618_v17 = vpop.f32.mrf.mxu0 }
 0x202   :  { %v6619_v35 = vadd.f32 %v6618_v17, %v6549_v33 }
 0x203   :  { %v6688_v18 = vpop.f32.mrf.mxu1  ;;  %v6620_v19 = vpop.f32.mrf.mxu0 }
 0x204   :  { %v6689_v11 = vadd.f32 %v6688_v18, %v6619_v35 }
 0x205   :  { %v6690_v20 = vpop.f32.mrf.mxu1 }
 0x209   :  { %v6758_v21 = vpop.f32.mrf.mxu0 }
 0x20a   :  { %v6759_v39 = vadd.f32 %v6758_v21, %v6689_v11 }
 0x20b   :  { %v6828_v22 = vpop.f32.mrf.mxu1  ;;  %v6760_v23 = vpop.f32.mrf.mxu0 }
 0x20c   :  { %v6829_v41 = vadd.f32 %v6828_v22, %v6759_v39 }
 0x20d   :  { %v6830_v24 = vpop.f32.mrf.mxu1 }
 0x211   :  { %v6898_v25 = vpop.f32.mrf.mxu0 }
 0x212   :  { %v6899_v43 = vadd.f32 %v6898_v25, %v6829_v41 }
 0x213   :  { %v6968_v26 = vpop.f32.mrf.mxu1  ;;  %v6900_v27 = vpop.f32.mrf.mxu0 }
 0x214   :  { %v6969_v47 = vadd.f32 %v6968_v26, %v6899_v43 }
 0x215   :  { %v6970_v28 = vpop.f32.mrf.mxu1 }
 0x219   :  { %v7038_v30 = vpop.f32.mrf.mxu0 }
 0x21a   :  { %v7039_v48 = vadd.f32 %v7038_v30, %v6969_v47 }
 0x21b   :  { %v7108_v31 = vpop.f32.mrf.mxu1  ;;  %v7040_v32 = vpop.f32.mrf.mxu0 }
 0x21c   :  { %v7109_v52 = vadd.f32 %v7108_v31, %v7039_v48 }
 0x21d   :  { %v7110_v34 = vpop.f32.mrf.mxu1 }
 0x221   :  { %v7178_v36 = vpop.f32.mrf.mxu0 }
 0x222   :  { %v7179_v54 = vadd.f32 %v7178_v36, %v7109_v52 }
 0x223   :  { %v7248_v37 = vpop.f32.mrf.mxu1  ;;  %v7180_v38 = vpop.f32.mrf.mxu0 }
 0x224   :  { %v7249_v56 = vadd.f32 %v7248_v37, %v7179_v54 }
 0x225   :  { %v7250_v40 = vpop.f32.mrf.mxu1 }
 0x229   :  { %v7318_v42 = vpop.f32.mrf.mxu0 }
 0x22a   :  { %v7319_v59 = vadd.f32 %v7318_v42, %v7249_v56 }
 0x22b   :  { %v7388_v44 = vpop.f32.mrf.mxu1  ;;  %v7320_v45 = vpop.f32.mrf.mxu0 }
 0x22c   :  { %v7389_v61 = vadd.f32 %v7388_v44, %v7319_v59 }
 0x22d   :  { %v7390_v46 = vpop.f32.mrf.mxu1 }
 0x231   :  { %v7458_v49 = vpop.f32.mrf.mxu0 }
 0x232   :  { %v7459_v63 = vadd.f32 %v7458_v49, %v7389_v61 }
 0x233   :  { %v7528_v50 = vpop.f32.mrf.mxu1  ;;  %v7460_v51 = vpop.f32.mrf.mxu0 }
 0x234   :  { %v7529_v3 = vadd.f32 %v7528_v50, %v7459_v63 }
 0x235   :  { %v7530_v53 = vpop.f32.mrf.mxu1 }
 0x239   :  { %v7598_v55 = vpop.f32.mrf.mxu0 }
 0x23a   :  { %v7599_v4 = vadd.f32 %v7598_v55, %v7529_v3 }
 0x23b   :  { %v7668_v57 = vpop.f32.mrf.mxu1  ;;  %v7600_v58 = vpop.f32.mrf.mxu0 }
 0x23c   :  { %v7669_v8 = vadd.f32 %v7668_v57, %v7599_v4 }
 0x23d   :  { %v7670_v60 = vpop.f32.mrf.mxu1 }
 0x241   :  { %v7738_v62 = vpop.f32.mrf.mxu0 }
 0x242   :  { %v7739_v10 = vadd.f32 %v7738_v62, %v7669_v8 }
 0x243   :  { %v7808_v0 = vpop.f32.mrf.mxu1  ;;  %v7740_v1 = vpop.f32.mrf.mxu0 }
 0x244   :  { %v7809_v13 = vadd.f32 %v7808_v0, %v7739_v10 }
 0x245   :  { %v7810_v2 = vpop.f32.mrf.mxu1 }
 0x249   :  { %v7878_v5 = vpop.f32.mrf.mxu0 }
 0x24a   :  { %v7879_v16 = vadd.f32 %v7878_v5, %v7809_v13 }
 0x24b   :  { %v7948_v6 = vpop.f32.mrf.mxu1  ;;  %v7880_v7 = vpop.f32.mrf.mxu0 }
 0x24c   :  { %v7949_v18 = vadd.f32 %v7948_v6, %v7879_v16 }
 0x24d   :  { %v7950_v9 = vpop.f32.mrf.mxu1 }
 0x251   :  { %v8018_v12 = vpop.f32.mrf.mxu0 }
 0x252   :  { %v8019_v20 = vadd.f32 %v8018_v12, %v7949_v18 }
 0x253   :  { %v8088_v14 = vpop.f32.mrf.mxu1  ;;  %v8020_v15 = vpop.f32.mrf.mxu0 }
 0x254   :  { %v8089_v24 = vadd.f32 %v8088_v14, %v8019_v20 }
 0x255   :  { %v8090_v17 = vpop.f32.mrf.mxu1 }
 0x259   :  { %v8158_v19 = vpop.f32.mrf.mxu0 }
 0x25a   :  { %v8159_v25 = vadd.f32 %v8158_v19, %v8089_v24 }
 0x25b   :  { %v8228_v21 = vpop.f32.mrf.mxu1  ;;  %v8160_v22 = vpop.f32.mrf.mxu0 }
 0x25c   :  { %v8229_v29 = vadd.f32 %v8228_v21, %v8159_v25 }
 0x25d   :  { %v8230_v23 = vpop.f32.mrf.mxu1 }
 0x261   :  { %v8298_v26 = vpop.f32.mrf.mxu0 }
 0x262   :  { %v8299_v31 = vadd.f32 %v8298_v26, %v8229_v29 }
 0x263   :  { %v8368_v27 = vpop.f32.mrf.mxu1  ;;  %v8300_v28 = vpop.f32.mrf.mxu0 }
 0x264   :  { %v8369_v33 = vadd.f32 %v8368_v27, %v8299_v31 }
 0x265   :  { %v8370_v30 = vpop.f32.mrf.mxu1 }
 0x269   :  { %v8438_v32 = vpop.f32.mrf.mxu0 }
 0x26a   :  { %v8439_v36 = vadd.f32 %v8438_v32, %v8369_v33 }
 0x26b   :  { %v8508_v34 = vpop.f32.mrf.mxu1  ;;  %v8440_v35 = vpop.f32.mrf.mxu0 }
 0x26c   :  { %v8509_v37 = vadd.f32 %v8508_v34, %v8439_v36 }
 0x26d   :  { %v8510_v11 = vpop.f32.mrf.mxu1 }
 0x271   :  { %v8578_v38 = vpop.f32.mrf.mxu0 }
 0x272   :  { %v8579_v39 = vadd.f32 %v8578_v38, %v8509_v37 }
 0x273   :  { %v8648_v40 = vpop.f32.mrf.mxu1  ;;  %v8580_v41 = vpop.f32.mrf.mxu0 }
 0x274   :  { %v8649_v42 = vadd.f32 %v8648_v40, %v8579_v39 }
 0x275   :  { %v8690_v43 = vpop.f32.mrf.mxu1 }
 0x276   :  { %v8680_v44 = vmul.f32 -1.442695, %v8649_v42 }
 0x278   :  { %8699 = vpow2.f32 %v8680_v44 }
 0x285   :  { %v8700_v45 = vpop.eup %8699 }
 0x286   :  { %v8655_v46 = vadd.f32 1.0, %v8700_v45 }
 0x288   :  { %8701 = vrcp.f32 %v8655_v46 }
 0x295   :  { %v8702_v47 = vpop.eup %8701 }
 0x296   :  { %8659 = vst.msk [vmem:[#allocation7] sm:$0x3] %vm8658_vm2, %v8702_v47 }
 0x297   :  { %8754 = shalt.err (!%p8751_p0)
}
 0x298   :  { %8669 = dma.vmem_to_hbm [thread:$0]  %s8667_s9, 32, %s9064_s3, [#allocation4]  }
 0x299   :  { %8767 = dma.done.wait [#allocation4], 32  }
 0x29a   :  { %8768 = vsyncadd [#allocation4], 4294967264 }
 0x29b   :  { %8673 = vsyncpa [#allocation3], 1 }
 0x29c   :  { %8674 = vsyncpa [#allocation6], 1 }
 0x29d   :  { %8675 = vsyncpa [#allocation4], 1 }

</bundles_post_ra>
